<compile_context>
chip_gen: v5e
topology: v5e:2x2
jax: 0.10.0
libtpu: 0.0.40
codegen_flags: <defaults>
</compile_context>

<pallas_src>
import functools

import jax
import jax.numpy as jnp
from jax.experimental import pallas as pl
from jax.experimental.pallas import tpu as pltpu


def _round_up(n, m):
    return ((n + m - 1) // m) * m


def rnn_agent_kernel(state_ref, h0_ref,
                     ew1_ref, eb1_ref, ew2_ref, eb2_ref,
                     wih_ref, whh_ref, bih_ref, bhh_ref,
                     pw_ref, pb_ref,
                     probs_ref, h_out_ref,
                     *, num_layers, hp):
    f32 = jnp.float32
    bf16 = jnp.bfloat16
    HP = hp                                    # padded hidden width (mult of 128)

    # ---- embedding: Linear -> Tanh -> Linear -> Tanh (bf16 MXU, f32 math) ----
    s = state_ref[...].astype(bf16)
    x = jnp.tanh(jnp.dot(s, ew1_ref[...], preferred_element_type=f32) + eb1_ref[...])
    x = jnp.tanh(jnp.dot(x.astype(bf16), ew2_ref[...], preferred_element_type=f32)
                 + eb2_ref[...])

    # ---- hoist recurrent-side projections off the serial layer chain ----
    # gh[l] depends only on h0[l] (not on the layer-to-layer chain).
    h_prev = []
    gh = []
    for l in range(num_layers):                # static unroll
        h_l = h0_ref[l]                        # (TB, HP) f32
        h_prev.append(h_l)
        gh.append(jnp.dot(h_l.astype(bf16), whh_ref[l],
                          preferred_element_type=f32) + bhh_ref[l])

    # ---- stacked GRU, single time step (PyTorch gate order r, z, n) ----
    inp = x
    for l in range(num_layers):                # static unroll
        gi = jnp.dot(inp.astype(bf16), wih_ref[l],
                     preferred_element_type=f32) + bih_ref[l]
        # gate blocks are padded to HP (=128k) lanes -> slices are vreg-aligned
        r = jax.nn.sigmoid(gi[:, 0:HP] + gh[l][:, 0:HP])
        z = jax.nn.sigmoid(gi[:, HP:2 * HP] + gh[l][:, HP:2 * HP])
        n = jnp.tanh(gi[:, 2 * HP:3 * HP] + r * gh[l][:, 2 * HP:3 * HP])
        h_new = (1.0 - z) * n + z * h_prev[l]
        h_out_ref[l] = h_new
        inp = h_new                            # padded lanes stay exactly 0

    # ---- discrete policy head: Linear -> softmax (lane-dense padded output) --
    # padded bias lanes are -1e30 so padded logits contribute exp(.) == 0.
    logits = (jnp.dot(inp.astype(bf16), pw_ref[...], preferred_element_type=f32)
              + pb_ref[...])
    m = jnp.max(logits, axis=-1, keepdims=True)
    e = jnp.exp(logits - m)
    denom = jnp.sum(e, axis=-1, keepdims=True)
    probs_ref[...] = e * pl.reciprocal(denom, approx=True)


def rnn_agent_forward(state, hidden, packed):
    """Pallas equivalent of RNNAgent.forward (is_continuous=False, inference).

    Returns (x, probs, new_hidden):
      x          : (B, hidden_dim)      -- GRU output (== new_hidden[-1], seq axis squeezed)
      probs      : (B, num_discretes)   -- Categorical probabilities
      new_hidden : (num_layers, B, hidden_dim)
    """
    B = state.shape[0]
    L = packed["num_layers"]
    H = packed["hidden_dim"]
    A = packed["num_discretes"]
    IP = packed["in_pad"]
    HP = packed["h_pad"]
    AP = packed["a_pad"]

    # batch: pad to sublane granularity (8) and tile for the grid.
    TB = min(_round_up(B, 8), 512)
    BP = _round_up(B, TB)

    state_p = jnp.zeros((BP, IP), jnp.float32).at[:B, :state.shape[1]].set(state)
    hidden_p = jnp.zeros((L, BP, HP), jnp.float32).at[:, :B, :H].set(hidden)

    kernel = functools.partial(rnn_agent_kernel, num_layers=L, hp=HP)

    const2 = lambda i: (0, 0)
    const3 = lambda i: (0, 0, 0)
    in_specs = [
        pl.BlockSpec((TB, IP), lambda i: (i, 0)),          # state
        pl.BlockSpec((L, TB, HP), lambda i: (0, i, 0)),    # h0
        pl.BlockSpec((IP, HP), const2),                    # ew1
        pl.BlockSpec((1, HP), const2),                     # eb1
        pl.BlockSpec((HP, HP), const2),                    # ew2
        pl.BlockSpec((1, HP), const2),                     # eb2
        pl.BlockSpec((L, HP, 3 * HP), const3),             # wih (gate-block padded)
        pl.BlockSpec((L, HP, 3 * HP), const3),             # whh (gate-block padded)
        pl.BlockSpec((L, 1, 3 * HP), const3),              # bih
        pl.BlockSpec((L, 1, 3 * HP), const3),              # bhh
        pl.BlockSpec((HP, AP), const2),                    # pw
        pl.BlockSpec((1, AP), const2),                     # pb
    ]
    out_specs = (
        pl.BlockSpec((TB, AP), lambda i: (i, 0)),          # probs (lane-padded)
        pl.BlockSpec((L, TB, HP), lambda i: (0, i, 0)),    # new hidden (lane-padded)
    )
    out_shape = (jax.ShapeDtypeStruct((BP, AP), jnp.float32),
                 jax.ShapeDtypeStruct((L, BP, HP), jnp.float32))

    probs_p, h_out_p = pl.pallas_call(
        kernel,
        grid=(BP // TB,),
        in_specs=in_specs,
        out_specs=out_specs,
        out_shape=out_shape,
        compiler_params=pltpu.CompilerParams(
            dimension_semantics=("parallel",)),
    )(state_p, hidden_p,
      packed["ew1"], packed["eb1"], packed["ew2"], packed["eb2"],
      packed["wih"], packed["whh"], packed["bih"], packed["bhh"],
      packed["pw"], packed["pb"])

    new_hidden = h_out_p[:, :B, :H]
    probs = probs_p[:B, :A]
    x = new_hidden[-1]      # GRU output == last-layer hidden (seq_len == 1)
    return x, probs, new_hidden


def init_params(key, input_dim, linear_dim, hidden_dim, num_layers, num_discretes):
    """Logical f32 parameters (PyTorch layouts, pre-transposed to (in, out))."""
    # NOTE: stacked GRU weight arrays require linear_dim == hidden_dim (true here).
    assert linear_dim == hidden_dim
    orth = jax.nn.initializers.orthogonal(scale=2.0 ** 0.5)
    ks = jax.random.split(key, 8)
    H3 = 3 * hidden_dim
    k = 1.0 / (hidden_dim ** 0.5)
    return {
        # embedding (weights pre-transposed to (in, out), bias as (1, out))
        "ew1": orth(ks[0], (input_dim, linear_dim), jnp.float32),
        "eb1": jnp.zeros((1, linear_dim), jnp.float32),
        "ew2": orth(ks[1], (linear_dim, linear_dim), jnp.float32),
        "eb2": jnp.zeros((1, linear_dim), jnp.float32),
        # GRU (PyTorch default uniform(-1/sqrt(H), 1/sqrt(H)); gate order r, z, n)
        "wih": jax.random.uniform(ks[2], (num_layers, linear_dim, H3), jnp.float32, -k, k),
        "whh": jax.random.uniform(ks[3], (num_layers, hidden_dim, H3), jnp.float32, -k, k),
        "bih": jax.random.uniform(ks[4], (num_layers, 1, H3), jnp.float32, -k, k),
        "bhh": jax.random.uniform(ks[5], (num_layers, 1, H3), jnp.float32, -k, k),
        # discrete policy head
        "pw": orth(ks[6], (hidden_dim, num_discretes), jnp.float32),
        "pb": jnp.zeros((1, num_discretes), jnp.float32),
    }


def pack_params(params, input_dim, linear_dim, hidden_dim, num_layers, num_discretes):
    """Pad all feature axes to multiples of 128 lanes (zero padding keeps the
    recurrence exact in the padded lanes) and cast matmul weights to bf16."""
    bf16 = jnp.bfloat16
    IP = _round_up(max(input_dim, 1), 128)
    HP = _round_up(hidden_dim, 128)
    AP = _round_up(num_discretes, 128)
    H = hidden_dim
    L = num_layers

    def pad2(w, rows, cols, dtype):
        out = jnp.zeros((rows, cols), jnp.float32).at[:w.shape[0], :w.shape[1]].set(w)
        return out.astype(dtype)

    def pad_gates_w(w, in_dim, in_p):
        # (L, in_dim, 3H) -> (L, in_p, 3*HP); each gate block padded to HP lanes.
        out = jnp.zeros((L, in_p, 3 * HP), jnp.float32)
        for g in range(3):
            out = out.at[:, :in_dim, g * HP:g * HP + H].set(w[:, :, g * H:(g + 1) * H])
        return out.astype(bf16)

    def pad_gates_b(b):
        out = jnp.zeros((L, 1, 3 * HP), jnp.float32)
        for g in range(3):
            out = out.at[:, :, g * HP:g * HP + H].set(b[:, :, g * H:(g + 1) * H])
        return out

    pb = jnp.full((1, AP), -1e30, jnp.float32).at[:, :num_discretes].set(params["pb"])

    return {
        "ew1": pad2(params["ew1"], IP, HP, bf16),
        "eb1": pad2(params["eb1"], 1, HP, jnp.float32),
        "ew2": pad2(params["ew2"], HP, HP, bf16),
        "eb2": pad2(params["eb2"], 1, HP, jnp.float32),
        "wih": pad_gates_w(params["wih"], linear_dim, HP),
        "whh": pad_gates_w(params["whh"], hidden_dim, HP),
        "bih": pad_gates_b(params["bih"]),
        "bhh": pad_gates_b(params["bhh"]),
        "pw": pad2(params["pw"], HP, AP, bf16),
        "pb": pb,
        "num_layers": L,
        "hidden_dim": H,
        "num_discretes": num_discretes,
        "in_pad": IP,
        "h_pad": HP,
        "a_pad": AP,
    }


if __name__ == "__main__":
    # small shapes consistent with the module's forward
    B = 4              # num_envs (batch after _format reshape (1, num_envs, -1))
    input_dim = 16     # state_dim
    linear_dim = 32
    hidden_dim = 32
    num_layers = 2     # num_rnn_layers
    num_discretes = 6  # discrete action head (is_continuous=False)

    key = jax.random.PRNGKey(0)
    kp, ks, kh = jax.random.split(key, 3)

    params = init_params(kp, input_dim, linear_dim, hidden_dim, num_layers, num_discretes)
    packed = pack_params(params, input_dim, linear_dim, hidden_dim, num_layers, num_discretes)

    state = jax.random.normal(ks, (B, input_dim), jnp.float32)
    hidden = jax.random.normal(kh, (num_layers, B, hidden_dim), jnp.float32)

    # TODO(synk): Categorical sampling / log_prob / entropy (torch.distributions)
    # are host-side distribution utilities, not part of the compute hot path;
    # the kernel returns the softmax probabilities instead.
    x, probs, new_hidden = rnn_agent_forward(state, hidden, packed)
    jax.block_until_ready((x, probs, new_hidden))
    print("KERNEL_OK")
</pallas_src>

<mosaic_0001>
module attributes {stable_mosaic.version = 11 : i64} {
  func.func @rnn_agent_kernel(%arg0: i32, %arg1: memref<8x128xf32, #tpu.memory_space<vmem>>, %arg2: memref<2x8x128xf32, #tpu.memory_space<vmem>>, %arg3: memref<128x128xbf16, #tpu.memory_space<vmem>>, %arg4: memref<1x128xf32, #tpu.memory_space<vmem>>, %arg5: memref<128x128xbf16, #tpu.memory_space<vmem>>, %arg6: memref<1x128xf32, #tpu.memory_space<vmem>>, %arg7: memref<2x128x384xbf16, #tpu.memory_space<vmem>>, %arg8: memref<2x128x384xbf16, #tpu.memory_space<vmem>>, %arg9: memref<2x1x384xf32, #tpu.memory_space<vmem>>, %arg10: memref<2x1x384xf32, #tpu.memory_space<vmem>>, %arg11: memref<128x128xbf16, #tpu.memory_space<vmem>>, %arg12: memref<1x128xf32, #tpu.memory_space<vmem>>, %arg13: memref<8x128xf32, #tpu.memory_space<vmem>>, %arg14: memref<2x8x128xf32, #tpu.memory_space<vmem>>) attributes {dimension_semantics = [#tpu.dimension_semantics<parallel>], iteration_bounds = array<i64: 1>, scalar_prefetch = 0 : i64, scratch_operands = 0 : i64, tpu.core_type = #tpu.core_type<tc>, window_params = [{transform_indices = @transform_0, window_bounds = array<i64: 8, 128>}, {transform_indices = @transform_1, window_bounds = array<i64: 2, 8, 128>}, {pipeline_mode = #tpu.pipeline_mode<synchronous>, transform_indices = @transform_2, window_bounds = array<i64: 128, 128>}, {pipeline_mode = #tpu.pipeline_mode<synchronous>, transform_indices = @transform_3, window_bounds = array<i64: 1, 128>}, {pipeline_mode = #tpu.pipeline_mode<synchronous>, transform_indices = @transform_4, window_bounds = array<i64: 128, 128>}, {pipeline_mode = #tpu.pipeline_mode<synchronous>, transform_indices = @transform_5, window_bounds = array<i64: 1, 128>}, {pipeline_mode = #tpu.pipeline_mode<synchronous>, transform_indices = @transform_6, window_bounds = array<i64: 2, 128, 384>}, {pipeline_mode = #tpu.pipeline_mode<synchronous>, transform_indices = @transform_7, window_bounds = array<i64: 2, 128, 384>}, {pipeline_mode = #tpu.pipeline_mode<synchronous>, transform_indices = @transform_8, window_bounds = array<i64: 2, 1, 384>}, {pipeline_mode = #tpu.pipeline_mode<synchronous>, transform_indices = @transform_9, window_bounds = array<i64: 2, 1, 384>}, {pipeline_mode = #tpu.pipeline_mode<synchronous>, transform_indices = @transform_10, window_bounds = array<i64: 128, 128>}, {pipeline_mode = #tpu.pipeline_mode<synchronous>, transform_indices = @transform_11, window_bounds = array<i64: 1, 128>}, {transform_indices = @transform_12, window_bounds = array<i64: 8, 128>}, {transform_indices = @transform_13, window_bounds = array<i64: 2, 8, 128>}]} {
    %c0 = arith.constant 0 : index
    %c0_0 = arith.constant 0 : index
    %0 = vector.load %arg1[%c0, %c0_0] : memref<8x128xf32, #tpu.memory_space<vmem>>, vector<8x128xf32>
    %1 = arith.truncf %0 : vector<8x128xf32> to vector<8x128xbf16>
    %c0_1 = arith.constant 0 : index
    %c0_2 = arith.constant 0 : index
    %2 = vector.load %arg3[%c0_1, %c0_2] : memref<128x128xbf16, #tpu.memory_space<vmem>>, vector<128x128xbf16>
    %cst = arith.constant dense<0.000000e+00> : vector<8x128xf32>
    %3 = tpu.matmul %1, %2, %cst {dimension_numbers = #tpu.dot_dimension_numbers<[1], [0], [0], [1], [0, 0, 1, 1], [], []>} : vector<8x128xbf16>, vector<128x128xbf16>, vector<8x128xf32> -> vector<8x128xf32>
    %c0_3 = arith.constant 0 : index
    %c0_4 = arith.constant 0 : index
    %4 = vector.load %arg4[%c0_3, %c0_4] : memref<1x128xf32, #tpu.memory_space<vmem>>, vector<1x128xf32>
    %5 = vector.broadcast %4 : vector<1x128xf32> to vector<8x128xf32>
    %6 = arith.addf %3, %5 : vector<8x128xf32>
    %7 = math.tanh %6 : vector<8x128xf32>
    %8 = arith.truncf %7 : vector<8x128xf32> to vector<8x128xbf16>
    %c0_5 = arith.constant 0 : index
    %c0_6 = arith.constant 0 : index
    %9 = vector.load %arg5[%c0_5, %c0_6] : memref<128x128xbf16, #tpu.memory_space<vmem>>, vector<128x128xbf16>
    %cst_7 = arith.constant dense<0.000000e+00> : vector<8x128xf32>
    %10 = tpu.matmul %8, %9, %cst_7 {dimension_numbers = #tpu.dot_dimension_numbers<[1], [0], [0], [1], [0, 0, 1, 1], [], []>} : vector<8x128xbf16>, vector<128x128xbf16>, vector<8x128xf32> -> vector<8x128xf32>
    %c0_8 = arith.constant 0 : index
    %c0_9 = arith.constant 0 : index
    %11 = vector.load %arg6[%c0_8, %c0_9] : memref<1x128xf32, #tpu.memory_space<vmem>>, vector<1x128xf32>
    %12 = vector.broadcast %11 : vector<1x128xf32> to vector<8x128xf32>
    %13 = arith.addf %10, %12 : vector<8x128xf32>
    %14 = math.tanh %13 : vector<8x128xf32>
    %c0_10 = arith.constant 0 : index
    %c0_11 = arith.constant 0 : index
    %c0_12 = arith.constant 0 : index
    %15 = vector.load %arg2[%c0_10, %c0_11, %c0_12] : memref<2x8x128xf32, #tpu.memory_space<vmem>>, vector<1x8x128xf32>
    %16 = vector.shape_cast %15 : vector<1x8x128xf32> to vector<8x128xf32>
    %17 = arith.truncf %16 : vector<8x128xf32> to vector<8x128xbf16>
    %c0_13 = arith.constant 0 : index
    %c0_14 = arith.constant 0 : index
    %c0_15 = arith.constant 0 : index
    %18 = vector.load %arg8[%c0_13, %c0_14, %c0_15] : memref<2x128x384xbf16, #tpu.memory_space<vmem>>, vector<1x128x384xbf16>
    %19 = vector.shape_cast %18 : vector<1x128x384xbf16> to vector<128x384xbf16>
    %cst_16 = arith.constant dense<0.000000e+00> : vector<8x384xf32>
    %20 = tpu.matmul %17, %19, %cst_16 {dimension_numbers = #tpu.dot_dimension_numbers<[1], [0], [0], [1], [0, 0, 1, 1], [], []>} : vector<8x128xbf16>, vector<128x384xbf16>, vector<8x384xf32> -> vector<8x384xf32>
    %c0_17 = arith.constant 0 : index
    %c0_18 = arith.constant 0 : index
    %c0_19 = arith.constant 0 : index
    %21 = vector.load %arg10[%c0_17, %c0_18, %c0_19] : memref<2x1x384xf32, #tpu.memory_space<vmem>>, vector<1x1x384xf32>
    %22 = vector.shape_cast %21 : vector<1x1x384xf32> to vector<1x384xf32>
    %23 = vector.broadcast %22 : vector<1x384xf32> to vector<8x384xf32>
    %24 = arith.addf %20, %23 : vector<8x384xf32>
    %c1 = arith.constant 1 : index
    %c0_20 = arith.constant 0 : index
    %c0_21 = arith.constant 0 : index
    %25 = vector.load %arg2[%c1, %c0_20, %c0_21] : memref<2x8x128xf32, #tpu.memory_space<vmem>>, vector<1x8x128xf32>
    %26 = vector.shape_cast %25 : vector<1x8x128xf32> to vector<8x128xf32>
    %27 = arith.truncf %26 : vector<8x128xf32> to vector<8x128xbf16>
    %c1_22 = arith.constant 1 : index
    %c0_23 = arith.constant 0 : index
    %c0_24 = arith.constant 0 : index
    %28 = vector.load %arg8[%c1_22, %c0_23, %c0_24] : memref<2x128x384xbf16, #tpu.memory_space<vmem>>, vector<1x128x384xbf16>
    %29 = vector.shape_cast %28 : vector<1x128x384xbf16> to vector<128x384xbf16>
    %cst_25 = arith.constant dense<0.000000e+00> : vector<8x384xf32>
    %30 = tpu.matmul %27, %29, %cst_25 {dimension_numbers = #tpu.dot_dimension_numbers<[1], [0], [0], [1], [0, 0, 1, 1], [], []>} : vector<8x128xbf16>, vector<128x384xbf16>, vector<8x384xf32> -> vector<8x384xf32>
    %c1_26 = arith.constant 1 : index
    %c0_27 = arith.constant 0 : index
    %c0_28 = arith.constant 0 : index
    %31 = vector.load %arg10[%c1_26, %c0_27, %c0_28] : memref<2x1x384xf32, #tpu.memory_space<vmem>>, vector<1x1x384xf32>
    %32 = vector.shape_cast %31 : vector<1x1x384xf32> to vector<1x384xf32>
    %33 = vector.broadcast %32 : vector<1x384xf32> to vector<8x384xf32>
    %34 = arith.addf %30, %33 : vector<8x384xf32>
    %35 = arith.truncf %14 : vector<8x128xf32> to vector<8x128xbf16>
    %c0_29 = arith.constant 0 : index
    %c0_30 = arith.constant 0 : index
    %c0_31 = arith.constant 0 : index
    %36 = vector.load %arg7[%c0_29, %c0_30, %c0_31] : memref<2x128x384xbf16, #tpu.memory_space<vmem>>, vector<1x128x384xbf16>
    %37 = vector.shape_cast %36 : vector<1x128x384xbf16> to vector<128x384xbf16>
    %cst_32 = arith.constant dense<0.000000e+00> : vector<8x384xf32>
    %38 = tpu.matmul %35, %37, %cst_32 {dimension_numbers = #tpu.dot_dimension_numbers<[1], [0], [0], [1], [0, 0, 1, 1], [], []>} : vector<8x128xbf16>, vector<128x384xbf16>, vector<8x384xf32> -> vector<8x384xf32>
    %c0_33 = arith.constant 0 : index
    %c0_34 = arith.constant 0 : index
    %c0_35 = arith.constant 0 : index
    %39 = vector.load %arg9[%c0_33, %c0_34, %c0_35] : memref<2x1x384xf32, #tpu.memory_space<vmem>>, vector<1x1x384xf32>
    %40 = vector.shape_cast %39 : vector<1x1x384xf32> to vector<1x384xf32>
    %41 = vector.broadcast %40 : vector<1x384xf32> to vector<8x384xf32>
    %42 = arith.addf %38, %41 : vector<8x384xf32>
    %43 = vector.extract_strided_slice %42 {offsets = [0, 0], sizes = [8, 128], strides = [1, 1]} : vector<8x384xf32> to vector<8x128xf32>
    %44 = vector.extract_strided_slice %24 {offsets = [0, 0], sizes = [8, 128], strides = [1, 1]} : vector<8x384xf32> to vector<8x128xf32>
    %45 = arith.addf %43, %44 : vector<8x128xf32>
    %46 = arith.negf %45 : vector<8x128xf32>
    %47 = math.exp %46 : vector<8x128xf32>
    %cst_36 = arith.constant 1.000000e+00 : f32
    %48 = vector.broadcast %cst_36 : f32 to vector<8x128xf32>
    %49 = arith.addf %48, %47 : vector<8x128xf32>
    %50 = arith.divf %48, %49 : vector<8x128xf32>
    %51 = vector.extract_strided_slice %42 {offsets = [0, 128], sizes = [8, 128], strides = [1, 1]} : vector<8x384xf32> to vector<8x128xf32>
    %52 = vector.extract_strided_slice %24 {offsets = [0, 128], sizes = [8, 128], strides = [1, 1]} : vector<8x384xf32> to vector<8x128xf32>
    %53 = arith.addf %51, %52 : vector<8x128xf32>
    %54 = arith.negf %53 : vector<8x128xf32>
    %55 = math.exp %54 : vector<8x128xf32>
    %cst_37 = arith.constant 1.000000e+00 : f32
    %56 = vector.broadcast %cst_37 : f32 to vector<8x128xf32>
    %57 = arith.addf %56, %55 : vector<8x128xf32>
    %58 = arith.divf %56, %57 : vector<8x128xf32>
    %59 = vector.extract_strided_slice %42 {offsets = [0, 256], sizes = [8, 128], strides = [1, 1]} : vector<8x384xf32> to vector<8x128xf32>
    %60 = vector.extract_strided_slice %24 {offsets = [0, 256], sizes = [8, 128], strides = [1, 1]} : vector<8x384xf32> to vector<8x128xf32>
    %61 = arith.mulf %50, %60 : vector<8x128xf32>
    %62 = arith.addf %59, %61 : vector<8x128xf32>
    %63 = math.tanh %62 : vector<8x128xf32>
    %cst_38 = arith.constant 1.000000e+00 : f32
    %64 = vector.broadcast %cst_38 : f32 to vector<8x128xf32>
    %65 = arith.subf %64, %58 : vector<8x128xf32>
    %66 = arith.mulf %65, %63 : vector<8x128xf32>
    %67 = arith.mulf %58, %16 : vector<8x128xf32>
    %68 = arith.addf %66, %67 : vector<8x128xf32>
    %c0_39 = arith.constant 0 : index
    %c0_40 = arith.constant 0 : index
    %c0_41 = arith.constant 0 : index
    %69 = vector.load %arg14[%c0_39, %c0_40, %c0_41] : memref<2x8x128xf32, #tpu.memory_space<vmem>>, vector<1x8x128xf32>
    %70 = vector.shape_cast %69 : vector<1x8x128xf32> to vector<8x128xf32>
    %71 = vector.shape_cast %68 : vector<8x128xf32> to vector<1x8x128xf32>
    tpu.vector_store %arg14[%c0_39, %c0_40, %c0_41], %71 {strides = array<i32>} : memref<2x8x128xf32, #tpu.memory_space<vmem>>, vector<1x8x128xf32>,
    %72 = arith.truncf %68 : vector<8x128xf32> to vector<8x128xbf16>
    %c1_42 = arith.constant 1 : index
    %c0_43 = arith.constant 0 : index
    %c0_44 = arith.constant 0 : index
    %73 = vector.load %arg7[%c1_42, %c0_43, %c0_44] : memref<2x128x384xbf16, #tpu.memory_space<vmem>>, vector<1x128x384xbf16>
    %74 = vector.shape_cast %73 : vector<1x128x384xbf16> to vector<128x384xbf16>
    %cst_45 = arith.constant dense<0.000000e+00> : vector<8x384xf32>
    %75 = tpu.matmul %72, %74, %cst_45 {dimension_numbers = #tpu.dot_dimension_numbers<[1], [0], [0], [1], [0, 0, 1, 1], [], []>} : vector<8x128xbf16>, vector<128x384xbf16>, vector<8x384xf32> -> vector<8x384xf32>
    %c1_46 = arith.constant 1 : index
    %c0_47 = arith.constant 0 : index
    %c0_48 = arith.constant 0 : index
    %76 = vector.load %arg9[%c1_46, %c0_47, %c0_48] : memref<2x1x384xf32, #tpu.memory_space<vmem>>, vector<1x1x384xf32>
    %77 = vector.shape_cast %76 : vector<1x1x384xf32> to vector<1x384xf32>
    %78 = vector.broadcast %77 : vector<1x384xf32> to vector<8x384xf32>
    %79 = arith.addf %75, %78 : vector<8x384xf32>
    %80 = vector.extract_strided_slice %79 {offsets = [0, 0], sizes = [8, 128], strides = [1, 1]} : vector<8x384xf32> to vector<8x128xf32>
    %81 = vector.extract_strided_slice %34 {offsets = [0, 0], sizes = [8, 128], strides = [1, 1]} : vector<8x384xf32> to vector<8x128xf32>
    %82 = arith.addf %80, %81 : vector<8x128xf32>
    %83 = arith.negf %82 : vector<8x128xf32>
    %84 = math.exp %83 : vector<8x128xf32>
    %cst_49 = arith.constant 1.000000e+00 : f32
    %85 = vector.broadcast %cst_49 : f32 to vector<8x128xf32>
    %86 = arith.addf %85, %84 : vector<8x128xf32>
    %87 = arith.divf %85, %86 : vector<8x128xf32>
    %88 = vector.extract_strided_slice %79 {offsets = [0, 128], sizes = [8, 128], strides = [1, 1]} : vector<8x384xf32> to vector<8x128xf32>
    %89 = vector.extract_strided_slice %34 {offsets = [0, 128], sizes = [8, 128], strides = [1, 1]} : vector<8x384xf32> to vector<8x128xf32>
    %90 = arith.addf %88, %89 : vector<8x128xf32>
    %91 = arith.negf %90 : vector<8x128xf32>
    %92 = math.exp %91 : vector<8x128xf32>
    %cst_50 = arith.constant 1.000000e+00 : f32
    %93 = vector.broadcast %cst_50 : f32 to vector<8x128xf32>
    %94 = arith.addf %93, %92 : vector<8x128xf32>
    %95 = arith.divf %93, %94 : vector<8x128xf32>
    %96 = vector.extract_strided_slice %79 {offsets = [0, 256], sizes = [8, 128], strides = [1, 1]} : vector<8x384xf32> to vector<8x128xf32>
    %97 = vector.extract_strided_slice %34 {offsets = [0, 256], sizes = [8, 128], strides = [1, 1]} : vector<8x384xf32> to vector<8x128xf32>
    %98 = arith.mulf %87, %97 : vector<8x128xf32>
    %99 = arith.addf %96, %98 : vector<8x128xf32>
    %100 = math.tanh %99 : vector<8x128xf32>
    %cst_51 = arith.constant 1.000000e+00 : f32
    %101 = vector.broadcast %cst_51 : f32 to vector<8x128xf32>
    %102 = arith.subf %101, %95 : vector<8x128xf32>
    %103 = arith.mulf %102, %100 : vector<8x128xf32>
    %104 = arith.mulf %95, %26 : vector<8x128xf32>
    %105 = arith.addf %103, %104 : vector<8x128xf32>
    %c1_52 = arith.constant 1 : index
    %c0_53 = arith.constant 0 : index
    %c0_54 = arith.constant 0 : index
    %106 = vector.load %arg14[%c1_52, %c0_53, %c0_54] : memref<2x8x128xf32, #tpu.memory_space<vmem>>, vector<1x8x128xf32>
    %107 = vector.shape_cast %106 : vector<1x8x128xf32> to vector<8x128xf32>
    %108 = vector.shape_cast %105 : vector<8x128xf32> to vector<1x8x128xf32>
    tpu.vector_store %arg14[%c1_52, %c0_53, %c0_54], %108 {strides = array<i32>} : memref<2x8x128xf32, #tpu.memory_space<vmem>>, vector<1x8x128xf32>,
    %109 = arith.truncf %105 : vector<8x128xf32> to vector<8x128xbf16>
    %c0_55 = arith.constant 0 : index
    %c0_56 = arith.constant 0 : index
    %110 = vector.load %arg11[%c0_55, %c0_56] : memref<128x128xbf16, #tpu.memory_space<vmem>>, vector<128x128xbf16>
    %cst_57 = arith.constant dense<0.000000e+00> : vector<8x128xf32>
    %111 = tpu.matmul %109, %110, %cst_57 {dimension_numbers = #tpu.dot_dimension_numbers<[1], [0], [0], [1], [0, 0, 1, 1], [], []>} : vector<8x128xbf16>, vector<128x128xbf16>, vector<8x128xf32> -> vector<8x128xf32>
    %c0_58 = arith.constant 0 : index
    %c0_59 = arith.constant 0 : index
    %112 = vector.load %arg12[%c0_58, %c0_59] : memref<1x128xf32, #tpu.memory_space<vmem>>, vector<1x128xf32>
    %113 = vector.broadcast %112 : vector<1x128xf32> to vector<8x128xf32>
    %114 = arith.addf %111, %113 : vector<8x128xf32>
    %cst_60 = arith.constant dense<0xFF800000> : vector<8xf32>
    %115 = vector.multi_reduction <maximumf>, %114, %cst_60 [1] : vector<8x128xf32> to vector<8xf32>
    %116 = vector.shape_cast %115 : vector<8xf32> to vector<8x1xf32>
    %117 = vector.broadcast %116 : vector<8x1xf32> to vector<8x128xf32>
    %118 = arith.subf %114, %117 : vector<8x128xf32>
    %119 = math.exp %118 : vector<8x128xf32>
    %cst_61 = arith.constant dense<0.000000e+00> : vector<8xf32>
    %120 = vector.multi_reduction <add>, %119, %cst_61 [1] : vector<8x128xf32> to vector<8xf32>
    %121 = vector.shape_cast %120 : vector<8xf32> to vector<8x1xf32>
    %122 = tpu.reciprocal %121 {approx = true} : vector<8x1xf32> -> vector<8x1xf32>
    %123 = vector.broadcast %122 : vector<8x1xf32> to vector<8x128xf32>
    %124 = arith.mulf %119, %123 : vector<8x128xf32>
    %c0_62 = arith.constant 0 : index
    %c0_63 = arith.constant 0 : index
    %125 = vector.load %arg13[%c0_62, %c0_63] : memref<8x128xf32, #tpu.memory_space<vmem>>, vector<8x128xf32>
    tpu.vector_store %arg13[%c0_62, %c0_63], %124 {strides = array<i32>} : memref<8x128xf32, #tpu.memory_space<vmem>>, vector<8x128xf32>,
    return
  }
  func.func @transform_0(%arg0: i32) -> (i32, i32) {
    %c0_i32 = arith.constant 0 : i32
    %c0_i32_0 = arith.constant 0 : i32
    return %arg0, %c0_i32 : i32, i32
  }
  func.func @transform_1(%arg0: i32) -> (i32, i32, i32) {
    %c0_i32 = arith.constant 0 : i32
    %c0_i32_0 = arith.constant 0 : i32
    %c0_i32_1 = arith.constant 0 : i32
    return %c0_i32, %arg0, %c0_i32_0 : i32, i32, i32
  }
  func.func @transform_2(%arg0: i32) -> (i32, i32) {
    %c0_i32 = arith.constant 0 : i32
    %c0_i32_0 = arith.constant 0 : i32
    %c0_i32_1 = arith.constant 0 : i32
    return %c0_i32, %c0_i32_0 : i32, i32
  }
  func.func @transform_3(%arg0: i32) -> (i32, i32) {
    %c0_i32 = arith.constant 0 : i32
    %c0_i32_0 = arith.constant 0 : i32
    %c0_i32_1 = arith.constant 0 : i32
    return %c0_i32, %c0_i32_0 : i32, i32
  }
  func.func @transform_4(%arg0: i32) -> (i32, i32) {
    %c0_i32 = arith.constant 0 : i32
    %c0_i32_0 = arith.constant 0 : i32
    %c0_i32_1 = arith.constant 0 : i32
    return %c0_i32, %c0_i32_0 : i32, i32
  }
  func.func @transform_5(%arg0: i32) -> (i32, i32) {
    %c0_i32 = arith.constant 0 : i32
    %c0_i32_0 = arith.constant 0 : i32
    %c0_i32_1 = arith.constant 0 : i32
    return %c0_i32, %c0_i32_0 : i32, i32
  }
  func.func @transform_6(%arg0: i32) -> (i32, i32, i32) {
    %c0_i32 = arith.constant 0 : i32
    %c0_i32_0 = arith.constant 0 : i32
    %c0_i32_1 = arith.constant 0 : i32
    %c0_i32_2 = arith.constant 0 : i32
    return %c0_i32, %c0_i32_0, %c0_i32_1 : i32, i32, i32
  }
  func.func @transform_7(%arg0: i32) -> (i32, i32, i32) {
    %c0_i32 = arith.constant 0 : i32
    %c0_i32_0 = arith.constant 0 : i32
    %c0_i32_1 = arith.constant 0 : i32
    %c0_i32_2 = arith.constant 0 : i32
    return %c0_i32, %c0_i32_0, %c0_i32_1 : i32, i32, i32
  }
  func.func @transform_8(%arg0: i32) -> (i32, i32, i32) {
    %c0_i32 = arith.constant 0 : i32
    %c0_i32_0 = arith.constant 0 : i32
    %c0_i32_1 = arith.constant 0 : i32
    %c0_i32_2 = arith.constant 0 : i32
    return %c0_i32, %c0_i32_0, %c0_i32_1 : i32, i32, i32
  }
  func.func @transform_9(%arg0: i32) -> (i32, i32, i32) {
    %c0_i32 = arith.constant 0 : i32
    %c0_i32_0 = arith.constant 0 : i32
    %c0_i32_1 = arith.constant 0 : i32
    %c0_i32_2 = arith.constant 0 : i32
    return %c0_i32, %c0_i32_0, %c0_i32_1 : i32, i32, i32
  }
  func.func @transform_10(%arg0: i32) -> (i32, i32) {
    %c0_i32 = arith.constant 0 : i32
    %c0_i32_0 = arith.constant 0 : i32
    %c0_i32_1 = arith.constant 0 : i32
    return %c0_i32, %c0_i32_0 : i32, i32
  }
  func.func @transform_11(%arg0: i32) -> (i32, i32) {
    %c0_i32 = arith.constant 0 : i32
    %c0_i32_0 = arith.constant 0 : i32
    %c0_i32_1 = arith.constant 0 : i32
    return %c0_i32, %c0_i32_0 : i32, i32
  }
  func.func @transform_12(%arg0: i32) -> (i32, i32) {
    %c0_i32 = arith.constant 0 : i32
    %c0_i32_0 = arith.constant 0 : i32
    return %arg0, %c0_i32 : i32, i32
  }
  func.func @transform_13(%arg0: i32) -> (i32, i32, i32) {
    %c0_i32 = arith.constant 0 : i32
    %c0_i32_0 = arith.constant 0 : i32
    %c0_i32_1 = arith.constant 0 : i32
    return %c0_i32, %arg0, %c0_i32_0 : i32, i32, i32
  }
}

</mosaic_0001>

<bundles_post_ra>
// kernel: tpu_custom_call.1
= control target key start
LH: loop header
LB: loop body
LE: loop exit
PB: predicated region body
PF: predicated region fallthrough
CT: control target
= control target key end

     0   :  { %19 = vsyncpa [#allocation3], 0  ;;  %s2559_s0 = inlined_call_operand.hbm [shape: f32[8,128], index: 0, kind: input, shape index: {}]   ;;  %s2560_s1 = inlined_call_operand.hbm [shape: f32[2,8,128], index: 1, kind: input, shape index: {}]   ;;  %s2561_s2 = inlined_call_operand.hbm [shape: bf16[128,128], index: 2, kind: input, shape index: {}]   ;;  %s2562_s3 = inlined_call_operand.vmem [shape: f32[1,128], index: 3, kind: input, shape index: {}]   ;;  %s2563_s4 = inlined_call_operand.hbm [shape: bf16[128,128], index: 4, kind: input, shape index: {}]   ;;  %s2564_s5 = inlined_call_operand.hbm [shape: f32[1,128], index: 5, kind: input, shape index: {}]   ;;  %s2565_s6 = inlined_call_operand.hbm [shape: bf16[2,128,384], index: 6, kind: input, shape index: {}]   ;;  %s2566_s7 = inlined_call_operand.hbm [shape: bf16[2,128,384], index: 7, kind: input, shape index: {}]   ;;  %s2567_s8 = inlined_call_operand.vmem [shape: f32[2,1,384], index: 8, kind: input, shape index: {}]   ;;  %s2568_s9 = inlined_call_operand.hbm [shape: f32[2,1,384], index: 9, kind: input, shape index: {}]   ;;  %s2569_s10 = inlined_call_operand.hbm [shape: bf16[128,128], index: 10, kind: input, shape index: {}]   ;;  %s2570_s11 = inlined_call_operand.vmem [shape: f32[1,128], index: 11, kind: input, shape index: {}]   ;;  %s2571_s12 = inlined_call_operand.hbm [shape: f32[8,128], index: 12, kind: output, shape index: {0}]   ;;  %s2572_s13 = inlined_call_operand.hbm [shape: f32[2,8,128], index: 13, kind: output, shape index: {1}]  }
   0x1   :  { %20 = vsyncpa [#allocation6], 0 }
   0x2   :  { %21 = vsyncpa [#allocation9], 0 }
   0x3   :  { %22 = vsyncpa [#allocation12], 0 }
   0x4   :  { %23 = vsyncpa [#allocation15], 0 }
   0x5   :  { %24 = vsyncpa [#allocation4], 0  ;;  %s41_s27 = sshll.u32 %s2560_s1, 4  ;;  %s42_s27 = int_to_ptr.hbm [resolvable:$true] %s41_s27 }
   0x6   :  { %25 = vsyncpa [#allocation19], 0  ;;  %s2348_s28 = smov [#allocation5]   ;;  %s2573_s30 = smov 128  }
   0x7   :  { %s43_s29 = sshll.u32 %s2348_s28, 4  ;;  %s2350_s14 = smov 8   ;;  %s44_s29 = int_to_ptr.vmem [resolvable:$true] %s43_s29 }
   0x8   :  { %49 = dma.hbm_to_vmem [thread:$0]  %s42_s27, 256, %s44_s29, [#allocation6], %s2573_s30, %s2573_s30, %s2350_s14  }
   0x9   :  { %s69_s17 = sshll.u32 %s2563_s4, 4  ;;  %s2351_s18 = smov [#allocation8]   ;;  %s70_s17 = int_to_ptr.hbm [resolvable:$true] %s69_s17 }
   0xa   :  { %s71_s19 = sshll.u32 %s2351_s18, 4  ;;  %s93_s21 = sshll.u32 %s2565_s6, 4  ;;  %s72_s19 = int_to_ptr.vmem [resolvable:$true] %s71_s19  ;;  %s94_s21 = int_to_ptr.hbm [resolvable:$true] %s93_s21 }
   0xb   :  { %s2352_s22 = smov 64   ;;  %s2353_s23 = smov 4  }
   0xc   :  { %77 = dma.hbm_to_vmem [thread:$0]  %s70_s17, 1024, %s72_s19, [#allocation9], %s2352_s22, %s2352_s22, %s2353_s23  }
   0xd   :  { %s2354_s24 = smov [#allocation11]   ;;  %s121_s27 = sshll.u32 %s2568_s9, 4  ;;  %s122_s27 = int_to_ptr.hbm [resolvable:$true] %s121_s27 }
   0xe   :  { %s95_s25 = sshll.u32 %s2354_s24, 4  ;;  %s2355_s28 = smov 192   ;;  %s96_s25 = int_to_ptr.vmem [resolvable:$true] %s95_s25 }
   0xf   :  { %s2356_s29 = smov 12   ;;  %s2357_s6 = smov [#allocation14]  }
  0x10   :  { %101 = dma.hbm_to_vmem [thread:$0]  %s94_s21, 6144, %s96_s25, [#allocation12], %s2355_s28, %s2355_s28, %s2356_s29  }
  0x11   :  { %s123_s15 = sshll.u32 %s2357_s6, 4  ;;  %s2358_s16 = smov 48   ;;  %s124_s15 = int_to_ptr.vmem [resolvable:$true] %s123_s15 }
  0x12   :  { %s2359_s18 = smov 3   ;;  %s31_s20 = sshll.u32 %s2559_s0, 4  ;;  %s32_s20 = int_to_ptr.hbm [resolvable:$true] %s31_s20 }
  0x13   :  { %129 = dma.hbm_to_vmem [thread:$0]  %s122_s27, 96, %s124_s15, [#allocation15], %s2358_s16, %s2358_s16, %s2359_s18  }
  0x14   :  { %s2360_s1 = smov [#allocation2]   ;;  %s54_s4 = sshll.u32 %s2561_s2, 4  ;;  %s55_s4 = int_to_ptr.hbm [resolvable:$true] %s54_s4 }
  0x15   :  { %s33_s9 = sshll.u32 %s2360_s1, 4  ;;  %s2361_s21 = smov [#allocation7]   ;;  %s34_s9 = int_to_ptr.vmem [resolvable:$true] %s33_s9 }
  0x16   :  { %36 = dma.hbm_to_vmem [thread:$0]  %s32_s20, 128, %s34_s9, [#allocation3]  }
  0x17   :  { %s56_s25 = sshll.u32 %s2361_s21, 4  ;;  %s83_s27 = sshll.u32 %s2564_s5, 4  ;;  %s57_s25 = int_to_ptr.vmem [resolvable:$true] %s56_s25  ;;  %s84_s27 = int_to_ptr.hbm [resolvable:$true] %s83_s27 }
  0x18   :  { %62 = dma.hbm_to_vmem [thread:$0]  %s55_s4, 1024, %s57_s25, [#allocation6], %s2352_s22, %s2352_s22, %s2353_s23  }
  0x19   :  { %s106_s16 = sshll.u32 %s2566_s7, 4  ;;  %s2362_s18 = smov [#allocation10]   ;;  %s107_s16 = int_to_ptr.hbm [resolvable:$true] %s106_s16 }
  0x1a   :  { %s85_s2 = sshll.u32 %s2362_s18, 4  ;;  %s2363_s17 = smov [#allocation13]   ;;  %s86_s2 = int_to_ptr.vmem [resolvable:$true] %s85_s2 }
  0x1b   :  { %88 = dma.hbm_to_vmem [thread:$0]  %s84_s27, 16, %s86_s2, [#allocation9]  }
  0x1c   :  { %s108_s19 = sshll.u32 %s2363_s17, 4  ;;  %s134_s5 = sshll.u32 %s2569_s10, 4  ;;  %s109_s19 = int_to_ptr.vmem [resolvable:$true] %s108_s19  ;;  %s135_s5 = int_to_ptr.hbm [resolvable:$true] %s134_s5 }
  0x1d   :  { %114 = dma.hbm_to_vmem [thread:$0]  %s107_s16, 6144, %s109_s19, [#allocation12], %s2355_s28, %s2355_s28, %s2356_s29  }
  0x1e   :  { %s2364_s1 = smov [#allocation16]  }
  0x1f   :  { %s136_s9 = sshll.u32 %s2364_s1, 4  ;;  %s137_s9 = int_to_ptr.vmem [resolvable:$true] %s136_s9 }
  0x20   :  { %142 = dma.hbm_to_vmem [thread:$0]  %s135_s5, 1024, %s137_s9, [#allocation15], %s2352_s22, %s2352_s22, %s2353_s23  }
  0x21   :  { %2334 = dma.done.wait [#allocation3], 128  }
  0x22   :  { %2335 = vsyncadd [#allocation3], 4294967168 }
  0x23   :  { %2336 = dma.done.wait [#allocation6], 1280  }
  0x24   :  { %2337 = vsyncadd [#allocation6], 4294966016 }
  0x25   :  { %2338 = dma.done.wait [#allocation9], 1040  }
  0x26   :  { %2339 = vsyncadd [#allocation9], 4294966256 }
  0x27   :  { %2340 = dma.done.wait [#allocation12], 12288  }
  0x28   :  { %2341 = vsyncadd [#allocation12], 4294955008 }
  0x29   :  { %2342 = dma.done.wait [#allocation15], 1120  }
  0x2a   :  { %2343 = vsyncadd [#allocation15], 4294966176  ;;  %v1907_v0 = vld [vmem:[#allocation7 + $0x38] sm:$0xff]  ;;  %v1906_v1 = vld [vmem:[#allocation7 + $0x30] sm:$0xff]  ;;  %s2365_s24 = smov [#allocation18]   ;;  %s1393_s25 = sshll.u32 %s2572_s13, 4  ;;  %s1394_s25 = int_to_ptr.hbm [resolvable:$true] %s1393_s25 }
  0x2b   :  { %251 = vmatpush.bf16.msra.mxu0 %v1907_v0  ;;  %v1915_v2 = vld [vmem:[#allocation8 + $0x38] sm:$0xff]  ;;  %v1914_v3 = vld [vmem:[#allocation8 + $0x30] sm:$0xff]  ;;  %v1905_v4 = vld [vmem:[#allocation7 + $0x28] sm:$0xff]  ;;  %s1391_s26 = sshll.u32 %s2365_s24, 4  ;;  %s2366_s6 = smov [#allocation17]   ;;  %s1392_s26 = int_to_ptr.vmem [resolvable:$true] %s1391_s26 }
  0x2c   :  { %334 = vmatpush.bf16.msra.mxu1 %v1915_v2  ;;  %v1913_v5 = vld [vmem:[#allocation8 + $0x28] sm:$0xff]  ;;  %v1904_v6 = vld [vmem:[#allocation7 + $0x20] sm:$0xff]  ;;  %v1903_v8 = vld [vmem:[#allocation7 + $0x18] sm:$0xff]  ;;  %s1381_s27 = sshll.u32 %s2366_s6, 4  ;;  %s1383_s16 = sshll.u32 %s2571_s12, 4  ;;  %s1382_s27 = int_to_ptr.vmem [resolvable:$true] %s1381_s27  ;;  %s1384_s16 = int_to_ptr.hbm [resolvable:$true] %s1383_s16 }
  0x2d   :  { %v1912_v7 = vld [vmem:[#allocation8 + $0x20] sm:$0xff]  ;;  %v1911_v9 = vld [vmem:[#allocation8 + $0x18] sm:$0xff]  ;;  %v1902_v10 = vld [vmem:[#allocation7 + $0x10] sm:$0xff] }
  0x2e   :  { %v1901_v11 = vld [vmem:[#allocation7 + $0x8] sm:$0xff]  ;;  %v1900_v12 = vld [vmem:[#allocation7] sm:$0xff]  ;;  %v1910_v15 = vld [vmem:[#allocation8 + $0x10] sm:$0xff] }
  0x2f   :  { %252 = vmatpush.bf16.msra.mxu0 %v1906_v1  ;;  %v181_v13 = vld [vmem:[#allocation2] sm:$0xff]  ;;  %v1908_v17 = vld [vmem:[#allocation8] sm:$0xff]  ;;  %v1938_v19 = vld [vmem:[#allocation13 + $0xb0] sm:$0xf0] }
  0x30   :  { %335 = vmatpush.bf16.msra.mxu1 %v1914_v3  ;;  %v182_v14 = vpack.c.bf16 %v181_v13, %v181_v13  ;;  %v1909_v16 = vld [vmem:[#allocation8 + $0x8] sm:$0xff]  ;;  %v1553_v20 = vld [vmem:[#allocation13 + $0x90] sm:$0xf]  ;;  %v1935_v22 = vld [vmem:[#allocation13 + $0x98] sm:$0xf0] }
  0x31   :  { %v1565_v18 = vld [vmem:[#allocation13 + $0xa8] sm:$0xf]  ;;  %v1554_v23 = vor.u32 %v1935_v22, %v1553_v20  ;;  %v1541_v24 = vld [vmem:[#allocation13 + $0x78] sm:$0xf]  ;;  %v1932_v25 = vld [vmem:[#allocation13 + $0x80] sm:$0xf0] }
  0x32   :  { %v1566_v21 = vor.u32 %v1938_v19, %v1565_v18  ;;  %v1573_v26 = vld [vmem:[#allocation13 + $0xb0] sm:$0xf]  ;;  %v1939_v27 = vld [vmem:[#allocation13 + $0xb8] sm:$0xf0]  ;;  %v1661_v29 = vld [vmem:[#allocation13 + $0x168] sm:$0xf]  ;;  %v1542_v31 = vor.u32 %v1932_v25, %v1541_v24 }
  0x33   :  { %253 = vmatpush.bf16.msra.mxu0 %v1905_v4  ;;  %v1574_v28 = vor.u32 %v1939_v27, %v1573_v26  ;;  %v1962_v30 = vld [vmem:[#allocation13 + $0x170] sm:$0xf0]  ;;  %v1529_v32 = vld [vmem:[#allocation13 + $0x60] sm:$0xf]  ;;  %v1561_v34 = vld [vmem:[#allocation13 + $0x98] sm:$0xf] }
  0x34   :  { %336 = vmatpush.bf16.msra.mxu1 %v1913_v5  ;;  %518 = vmatpush.bf16.msra.mxu2 %v1566_v21  ;;  %v1662_v33 = vor.u32 %v1962_v30, %v1661_v29  ;;  %v1936_v35 = vld [vmem:[#allocation13 + $0xa0] sm:$0xf0]  ;;  %v1929_v36 = vld [vmem:[#allocation13 + $0x68] sm:$0xf0]  ;;  %v1649_v38 = vld [vmem:[#allocation13 + $0x150] sm:$0xf] }
  0x35   :  { %v1562_v37 = vor.u32 %v1936_v35, %v1561_v34  ;;  %v1959_v39 = vld [vmem:[#allocation13 + $0x158] sm:$0xf0]  ;;  %v1549_v41 = vld [vmem:[#allocation13 + $0x80] sm:$0xf]  ;;  %v1933_v42 = vld [vmem:[#allocation13 + $0x88] sm:$0xf0]  ;;  %v1530_v45 = vor.u32 %v1929_v36, %v1529_v32 }
  0x36   :  { %v1650_v40 = vor.u32 %v1959_v39, %v1649_v38  ;;  %v1637_v43 = vld [vmem:[#allocation13 + $0x138] sm:$0xf]  ;;  %v1956_v44 = vld [vmem:[#allocation13 + $0x140] sm:$0xf0]  ;;  %v1517_v46 = vld [vmem:[#allocation13 + $0x48] sm:$0xf]  ;;  %v1550_v48 = vor.u32 %v1933_v42, %v1549_v41 }
  0x37   :  { %254 = vmatpush.bf16.msra.mxu0 %v1904_v6  ;;  %v1926_v47 = vld [vmem:[#allocation13 + $0x50] sm:$0xf0]  ;;  %v1638_v49 = vor.u32 %v1956_v44, %v1637_v43  ;;  %v1537_v50 = vld [vmem:[#allocation13 + $0x68] sm:$0xf]  ;;  %v1625_v52 = vld [vmem:[#allocation13 + $0x120] sm:$0xf] }
  0x38   :  { %337 = vmatpush.bf16.msra.mxu1 %v1912_v7  ;;  %519 = vmatpush.bf16.msra.mxu2 %v1554_v23  ;;  %v1930_v51 = vld [vmem:[#allocation13 + $0x70] sm:$0xf0]  ;;  %v1953_v53 = vld [vmem:[#allocation13 + $0x128] sm:$0xf0]  ;;  %v1518_v54 = vor.u32 %v1926_v47, %v1517_v46  ;;  %v1505_v55 = vld [vmem:[#allocation13 + $0x30] sm:$0xf] }
  0x39   :  { %v1923_v56 = vld [vmem:[#allocation13 + $0x38] sm:$0xf0]  ;;  %v1538_v57 = vor.u32 %v1930_v51, %v1537_v50  ;;  %v2039_v58 = vld [vmem:[%s2562_s3] ss:$0 sm:$0xff]  ;;  %v1626_v59 = vor.u32 %v1953_v53, %v1625_v52  ;;  %v1525_v60 = vld [vmem:[#allocation13 + $0x50] sm:$0xf] }
  0x3a   :  { %v1927_v61 = vld [vmem:[#allocation13 + $0x58] sm:$0xf0]  ;;  %v1613_v62 = vld [vmem:[#allocation13 + $0x108] sm:$0xf]  ;;  %v1950_v63 = vld [vmem:[#allocation13 + $0x110] sm:$0xf0]  ;;  %v1506_v0 = vor.u32 %v1923_v56, %v1505_v55 }
  0x3b   :  { %255 = vmatpush.bf16.msra.mxu0 %v1903_v8  ;;  %v1493_v1 = vld [vmem:[#allocation13 + $0x18] sm:$0xf]  ;;  %v1920_v3 = vld [vmem:[#allocation13 + $0x20] sm:$0xf0]  ;;  %v1526_v4 = vor.u32 %v1927_v61, %v1525_v60  ;;  %v1937_v5 = vld [vmem:[#allocation13 + $0xac] sm:$0xf]  ;;  %v1614_v8 = vor.u32 %v1950_v63, %v1613_v62 }
  0x3c   :  { %338 = vmatpush.bf16.msra.mxu1 %v1911_v9  ;;  %520 = vmatpush.bf16.msra.mxu2 %v1542_v31  ;;  %v1567_v6 = vld [vmem:[#allocation13 + $0xb4] sm:$0xf0]  ;;  %v1947_v13 = vld [vmem:[#allocation13 + $0xf8] sm:$0xf0]  ;;  %v1934_v18 = vld [vmem:[#allocation13 + $0x94] sm:$0xf] }
  0x3d   :  { %v1513_v9 = vld [vmem:[#allocation13 + $0x38] sm:$0xf]  ;;  %v1555_v19 = vld [vmem:[#allocation13 + $0x9c] sm:$0xf0]  ;;  %v1961_v20 = vld [vmem:[#allocation13 + $0x16c] sm:$0xf] }
  0x3e   :  { %v1663_v21 = vld [vmem:[#allocation13 + $0x174] sm:$0xf0]  ;;  %v1501_v23 = vld [vmem:[#allocation13 + $0x20] sm:$0xf]  ;;  %v1558_v24 = vor.u32 %v1934_v18, %v1555_v19  ;;  %v1921_v25 = vld [vmem:[#allocation13 + $0x28] sm:$0xf0] }
  0x3f   :  { %256 = vmatpush.bf16.msra.mxu0 %v1902_v10  ;;  %v1924_v10 = vld [vmem:[#allocation13 + $0x40] sm:$0xf0]  ;;  %v1589_v26 = vld [vmem:[#allocation13 + $0xd8] sm:$0xf]  ;;  %v2485_v29 = vld [vmem:[#allocation5] sm:$0xff]  ;;  %v1666_v31 = vor.u32 %v1961_v20, %v1663_v21  ;;  %v1502_v36 = vor.u32 %v1921_v25, %v1501_v23 }
  0x40   :  { %339 = vmatpush.bf16.msra.mxu1 %v1910_v15  ;;  %521 = vmatpush.bf16.msra.mxu2 %v1530_v45  ;;  %v1481_v15 = vld [vmem:[#allocation13] sm:$0xf]  ;;  %v1944_v27 = vld [vmem:[#allocation13 + $0xe0] sm:$0xf0]  ;;  %v1958_v32 = vld [vmem:[#allocation13 + $0x154] sm:$0xf]  ;;  %v2489_v42 = vpack.c.bf16 %v2485_v29, %v2485_v29 }
  0x41   :  { %v1489_v34 = vld [vmem:[#allocation13 + $0x8] sm:$0xf]  ;;  %v1918_v38 = vld [vmem:[#allocation13 + $0x10] sm:$0xf0]  ;;  %v1577_v39 = vld [vmem:[#allocation13 + $0xc0] sm:$0xf] }
  0x42   :  { %v1757_v43 = vld [vmem:[#allocation11 + $0xa8] sm:$0xf]  ;;  %v1931_v44 = vld [vmem:[#allocation13 + $0x7c] sm:$0xf]  ;;  %v1986_v46 = vld [vmem:[#allocation11 + $0xb0] sm:$0xf0]  ;;  %v1490_v53 = vor.u32 %v1918_v38, %v1489_v34 }
  0x43   :  { %257 = vmatpush.bf16.msra.mxu0 %v1901_v11  ;;  %v1570_v11 = vor.u32 %v1937_v5, %v1567_v6  ;;  %v1543_v45 = vld [vmem:[#allocation13 + $0x84] sm:$0xf0]  ;;  %v1985_v47 = vld [vmem:[#allocation11 + $0xac] sm:$0xf]  ;;  %v1955_v51 = vld [vmem:[#allocation13 + $0x13c] sm:$0xf] }
  0x44   :  { %340 = vmatpush.bf16.msra.mxu1 %v1909_v16  ;;  %522 = vmatpush.bf16.msra.mxu2 %v1518_v54  ;;  %v1917_v16 = vld [vmem:[#allocation13 + $0x8] sm:$0xf0]  ;;  %v1639_v52 = vld [vmem:[#allocation13 + $0x144] sm:$0xf0]  ;;  %v1928_v55 = vld [vmem:[#allocation13 + $0x64] sm:$0xf] }
  0x45   :  { %531 = vmatpush.bf16.msra.mxu3 %v1570_v11  ;;  %v1531_v56 = vld [vmem:[#allocation13 + $0x6c] sm:$0xf0]  ;;  %v1983_v60 = vld [vmem:[#allocation11 + $0x98] sm:$0xf0]  ;;  %v1982_v61 = vld [vmem:[#allocation11 + $0x94] sm:$0xf] }
  0x46   :  { %v1747_v62 = vld [vmem:[#allocation11 + $0x9c] sm:$0xf0]  ;;  %v1534_v63 = vor.u32 %v1928_v55, %v1531_v56  ;;  %v1977_v21 = vld [vmem:[#allocation11 + $0x68] sm:$0xf0]  ;;  %v1723_v23 = vld [vmem:[#allocation11 + $0x6c] sm:$0xf0] }
  0x47   :  { %258 = vmatpush.bf16.msra.mxu0 %v1900_v12  ;;  %v1601_v12 = vld [vmem:[#allocation13 + $0xf0] sm:$0xf]  ;;  %v1750_v6 = vor.u32 %v1982_v61, %v1747_v62  ;;  %v1721_v20 = vld [vmem:[#allocation11 + $0x60] sm:$0xf]  ;;  %v1709_v34 = vld [vmem:[#allocation11 + $0x48] sm:$0xf] }
  0x48   :  { %341 = vmatpush.bf16.msra.mxu1 %v1908_v17  ;;  %523 = vmatpush.bf16.msra.mxu2 %v1506_v0  ;;  %v1514_v17 = vor.u32 %v1924_v10, %v1513_v9  ;;  %v1602_v22 = vor.u32 %v1947_v13, %v1601_v12  ;;  %v1642_v0 = vor.u32 %v1955_v51, %v1639_v52  ;;  %v1979_v9 = vld [vmem:[#allocation11 + $0x7c] sm:$0xf]  ;;  %v1735_v10 = vld [vmem:[#allocation11 + $0x84] sm:$0xf0]  ;;  %v1949_v13 = vld [vmem:[#allocation13 + $0x10c] sm:$0xf] }
  0x49   :  { %532 = vmatpush.bf16.msra.mxu3 %v1558_v24  ;;  %v1738_v19 = vor.u32 %v1979_v9, %v1735_v10  ;;  %v1753_v52 = vld [vmem:[#allocation11 + $0x98] sm:$0xf]  ;;  %v1741_v55 = vld [vmem:[#allocation11 + $0x80] sm:$0xf]  ;;  %v1981_v56 = vld [vmem:[#allocation11 + $0x88] sm:$0xf0] }
  0x4a   :  { %259 = vmatmul.bf16.vlgmr.msra.gmra.mxu0 %v182_v14  ;;  %v1494_v14 = vor.u32 %v1920_v3, %v1493_v1  ;;  %v1952_v1 = vld [vmem:[#allocation13 + $0x124] sm:$0xf]  ;;  %v1925_v3 = vld [vmem:[#allocation13 + $0x4c] sm:$0xf]  ;;  %v1717_v61 = vld [vmem:[#allocation11 + $0x50] sm:$0xf] }
  0x4b   :  { %544 = vmatpush.bf16.msrb.mxu0 %v1574_v28  ;;  %v1482_v28 = vor.u32 %v1917_v16, %v1481_v15  ;;  %v1922_v15 = vld [vmem:[#allocation13 + $0x34] sm:$0xf]  ;;  %v1507_v16 = vld [vmem:[#allocation13 + $0x3c] sm:$0xf0]  ;;  %v1975_v62 = vld [vmem:[#allocation11 + $0x58] sm:$0xf0] }
  0x4c   :  { %730 = vmatpush.bf16.msrb.mxu1 %v1662_v33  ;;  %524 = vmatpush.bf16.msra.mxu2 %v1494_v14  ;;  %v1651_v33 = vld [vmem:[#allocation13 + $0x15c] sm:$0xf0]  ;;  %v1615_v14 = vld [vmem:[#allocation13 + $0x114] sm:$0xf0]  ;;  %v1510_v24 = vor.u32 %v1922_v15, %v1507_v16  ;;  %v1916_v9 = vld [vmem:[#allocation13 + $0x4] sm:$0xf] }
  0x4d   :  { %v1654_v50 = vor.u32 %v1958_v32, %v1651_v33  ;;  %v1618_v25 = vor.u32 %v1949_v13, %v1615_v14  ;;  %v1722_v32 = vor.u32 %v1977_v21, %v1721_v20  ;;  %v1483_v10 = vld [vmem:[#allocation13 + $0xc] sm:$0xf0]  ;;  %v1968_v13 = vld [vmem:[#allocation11 + $0x20] sm:$0xf0]  ;;  %v1967_v14 = vld [vmem:[#allocation11 + $0x1c] sm:$0xf] }
  0x4e   :  { %v1687_v16 = vld [vmem:[#allocation11 + $0x24] sm:$0xf0] }
  0x4f   :  { %545 = vmatpush.bf16.msrb.mxu0 %v1562_v37  ;;  %v1590_v37 = vor.u32 %v1944_v27, %v1589_v26  ;;  %v1946_v26 = vld [vmem:[#allocation13 + $0xf4] sm:$0xf]  ;;  %v1690_v20 = vor.u32 %v1967_v14, %v1687_v16  ;;  %v1864_v14 = vld [vmem:[#allocation11 + $0x170] sm:$0xf] }
  0x50   :  { %731 = vmatpush.bf16.msrb.mxu1 %v1650_v40  ;;  %v1941_v40 = vld [vmem:[#allocation13 + $0xc8] sm:$0xf0]  ;;  %525 = vmatpush.bf16.msra.mxu2 %v1482_v28  ;;  %v1603_v28 = vld [vmem:[#allocation13 + $0xfc] sm:$0xf0] }
  0x51   :  { %v1578_v54 = vor.u32 %v1941_v40, %v1577_v39  ;;  %v1606_v39 = vor.u32 %v1946_v26, %v1603_v28  ;;  %v1943_v40 = vld [vmem:[#allocation13 + $0xdc] sm:$0xf]  ;;  %v1675_v26 = vld [vmem:[#allocation11 + $0xc] sm:$0xf0]  ;;  %v1681_v28 = vld [vmem:[#allocation11 + $0x8] sm:$0xf] }
  0x53   :  { %546 = vmatpush.bf16.msrb.mxu0 %v1550_v48  ;;  %v1759_v48 = vld [vmem:[#allocation11 + $0xb4] sm:$0xf0]  ;;  %526 = vmatmul.bf16.vlgmr.msra.gmra.mxu2 %v2489_v42 }
  0x54   :  { %732 = vmatpush.bf16.msrb.mxu1 %v1638_v49  ;;  %v1546_v49 = vor.u32 %v1931_v44, %v1543_v45  ;;  %743 = vmatpush.bf16.msrb.mxu2 %v1666_v31  ;;  %v1495_v31 = vld [vmem:[#allocation13 + $0x24] sm:$0xf0] }
  0x56   :  { %533 = vmatpush.bf16.msra.mxu3 %v1546_v49  ;;  %v1987_v49 = vld [vmem:[#allocation11 + $0xb8] sm:$0xf0] }
  0x57   :  { %547 = vmatpush.bf16.msrb.mxu0 %v1538_v57  ;;  %v1758_v57 = vor.u32 %v1986_v46, %v1757_v43  ;;  %v1940_v46 = vld [vmem:[#allocation13 + $0xc4] sm:$0xf] }
  0x58   :  { %733 = vmatpush.bf16.msrb.mxu1 %v1626_v59  ;;  %v1745_v59 = vld [vmem:[#allocation11 + $0x90] sm:$0xf]  ;;  %744 = vmatpush.bf16.msrb.mxu2 %v1654_v50 }
  0x59   :  { %v1746_v5 = vor.u32 %v1983_v60, %v1745_v59  ;;  %v1978_v59 = vld [vmem:[#allocation11 + $0x70] sm:$0xf0] }
  0x5a   :  { %534 = vmatpush.bf16.msra.mxu3 %v1534_v63  ;;  %v1718_v63 = vor.u32 %v1975_v62, %v1717_v61  ;;  %v1951_v61 = vld [vmem:[#allocation13 + $0x118] sm:$0xf0] }
  0x5b   :  { %548 = vmatpush.bf16.msrb.mxu0 %v1526_v4  ;;  %v1519_v4 = vld [vmem:[#allocation13 + $0x54] sm:$0xf0] }
  0x5c   :  { %734 = vmatpush.bf16.msrb.mxu1 %v1614_v8  ;;  %v1980_v8 = vld [vmem:[#allocation11 + $0x80] sm:$0xf0]  ;;  %v1522_v11 = vor.u32 %v1925_v3, %v1519_v4  ;;  %745 = vmatpush.bf16.msrb.mxu2 %v1642_v0  ;;  %v1697_v0 = vld [vmem:[#allocation11 + $0x30] sm:$0xf]  ;;  %v1699_v4 = vld [vmem:[#allocation11 + $0x3c] sm:$0xf0] }
  0x5e   :  { %535 = vmatpush.bf16.msra.mxu3 %v1522_v11  ;;  %v1486_v11 = vor.u32 %v1916_v9, %v1483_v10  ;;  %v1856_v9 = vld [vmem:[#allocation11 + $0x168] sm:$0xf]  ;;  %v2010_v10 = vld [vmem:[#allocation11 + $0x170] sm:$0xf0] }
  0x5f   :  { %549 = vmatpush.bf16.msrb.mxu0 %v1514_v17  ;;  %v2493_v17 = vld [vmem:[#allocation5 + $0x8] sm:$0xff] }
  0x60   :  { %735 = vmatpush.bf16.msrb.mxu1 %v1602_v22  ;;  %v1976_v22 = vld [vmem:[#allocation11 + $0x64] sm:$0xf]  ;;  %v2497_v27 = vpack.c.bf16 %v2493_v17, %v2493_v17 }
  0x61   :  { %v1726_v33 = vor.u32 %v1976_v22, %v1723_v23  ;;  %v1673_v22 = vld [vmem:[#allocation11] sm:$0xf]  ;;  %v1965_v23 = vld [vmem:[#allocation11 + $0x8] sm:$0xf0] }
  0x62   :  { %536 = vmatpush.bf16.msra.mxu3 %v1510_v24  ;;  %v1964_v24 = vld [vmem:[#allocation11 + $0x4] sm:$0xf] }
  0x63   :  { %550 = vmatpush.bf16.msrb.mxu0 %v1502_v36  ;;  %v1973_v36 = vld [vmem:[#allocation11 + $0x4c] sm:$0xf] }
  0x64   :  { %736 = vmatpush.bf16.msrb.mxu1 %v1590_v37  ;;  %v1711_v37 = vld [vmem:[#allocation11 + $0x54] sm:$0xf0] }
  0x65   :  { %v1714_v44 = vor.u32 %v1973_v36, %v1711_v37  ;;  %v1669_v36 = vld [vmem:[#allocation13 + $0x170] sm:$0xf]  ;;  %v1963_v37 = vld [vmem:[#allocation13 + $0x178] sm:$0xf0] }
  0x67   :  { %551 = vmatpush.bf16.msrb.mxu0 %v1490_v53  ;;  %v1984_v53 = vld [vmem:[#allocation11 + $0xa0] sm:$0xf0] }
  0x68   :  { %737 = vmatpush.bf16.msrb.mxu1 %v1578_v54  ;;  %v1754_v54 = vor.u32 %v1984_v53, %v1753_v52 }
  0x6a   :  { %552 = vmatmul.bf16.vlgmr.msrb.gmra.mxu0 %v2489_v42 }
  0x6b   :  { %938 = vmatpush.bf16.msra.mxu0 %v1758_v57  ;;  %v1742_v57 = vor.u32 %v1981_v56, %v1741_v55  ;;  %v1633_v56 = vld [vmem:[#allocation13 + $0x128] sm:$0xf] }
  0x6f   :  { %939 = vmatpush.bf16.msra.mxu0 %v1746_v5  ;;  %v1705_v5 = vld [vmem:[#allocation11 + $0x38] sm:$0xf] }
  0xc7   :  { %v260_v2 = vpop.f32.mrf.mxu0 }
  0xc8   :  { %v261_v7 = vadd.f32 %v2039_v58, %v260_v2  ;;  %v1762_v58 = vor.u32 %v1985_v47, %v1759_v48  ;;  %v1627_v2 = vld [vmem:[#allocation13 + $0x12c] sm:$0xf0] }
  0xc9   :  { %v1630_v12 = vor.u32 %v1952_v1, %v1627_v2  ;;  %v1579_v47 = vld [vmem:[#allocation13 + $0xcc] sm:$0xf0]  ;;  %v1971_v1 = vld [vmem:[#allocation11 + $0x38] sm:$0xf0]  ;;  %v1970_v2 = vld [vmem:[#allocation11 + $0x34] sm:$0xf] }
  0xca   :  { %2042 = vtanh.f32 %v261_v7  ;;  %v1733_v7 = vld [vmem:[#allocation11 + $0x78] sm:$0xf]  ;;  %v1765_v48 = vld [vmem:[#allocation11 + $0xb0] sm:$0xf]  ;;  %v1582_v50 = vor.u32 %v1940_v46, %v1579_v47  ;;  %v1698_v3 = vor.u32 %v1971_v1, %v1697_v0  ;;  %v1645_v47 = vld [vmem:[#allocation13 + $0x140] sm:$0xf] }
  0xcb   :  { %v1734_v18 = vor.u32 %v1980_v8, %v1733_v7  ;;  %746 = vmatpush.bf16.msrb.mxu2 %v1630_v12  ;;  %v1766_v51 = vor.u32 %v1987_v49, %v1765_v48  ;;  %v1702_v7 = vor.u32 %v1970_v2, %v1699_v4  ;;  %v1685_v12 = vld [vmem:[#allocation11 + $0x18] sm:$0xf]  ;;  %v1957_v48 = vld [vmem:[#allocation13 + $0x148] sm:$0xf0]  ;;  %v1948_v0 = vld [vmem:[#allocation13 + $0x100] sm:$0xf0] }
  0xcc   :  { %v1686_v15 = vor.u32 %v1968_v13, %v1685_v12  ;;  %v1646_v49 = vor.u32 %v1957_v48, %v1645_v47  ;;  %v1945_v4 = vld [vmem:[#allocation13 + $0xe8] sm:$0xf0]  ;;  %v1857_v12 = vor.u32 %v2010_v10, %v1856_v9  ;;  %v1858_v13 = vld [vmem:[#allocation11 + $0x174] sm:$0xf0]  ;;  %v2000_v48 = vld [vmem:[#allocation11 + $0x124] sm:$0xf] }
  0xcd   :  { %940 = vmatpush.bf16.msra.mxu0 %v1734_v18  ;;  %v1693_v18 = vld [vmem:[#allocation11 + $0x20] sm:$0xf]  ;;  %v2001_v47 = vld [vmem:[#allocation11 + $0x128] sm:$0xf0] }
  0xcf   :  { %v262_v30 = vpop.f32.mrf.mxu0  ;;  %747 = vmatpush.bf16.msrb.mxu2 %v1618_v25  ;;  %v1674_v25 = vor.u32 %v1965_v23, %v1673_v22  ;;  %v1846_v23 = vld [vmem:[#allocation11 + $0x15c] sm:$0xf0] }
  0xd0   :  { %v2043_v35 = vpop.eup %2042  ;;  %v1919_v30 = vld [vmem:[#allocation13 + $0x1c] sm:$0xf] }
  0xd1   :  { %v265_v41 = vpack.c.bf16 %v2043_v35, %v2043_v35  ;;  %v1974_v35 = vld [vmem:[#allocation11 + $0x50] sm:$0xf0]  ;;  %v1498_v38 = vor.u32 %v1919_v30, %v1495_v31  ;;  %941 = vmatpush.bf16.msra.mxu0 %v1722_v32  ;;  %v1678_v31 = vor.u32 %v1964_v24, %v1675_v26  ;;  %v1852_v24 = vld [vmem:[#allocation11 + $0x158] sm:$0xf] }
  0xd2   :  { %v1710_v43 = vor.u32 %v1974_v35, %v1709_v34  ;;  %v1966_v30 = vld [vmem:[#allocation11 + $0x10] sm:$0xf0] }
  0xd3   :  { %342 = vmatmul.bf16.vlgmr.msra.gmra.mxu1 %v265_v41  ;;  %v1591_v41 = vld [vmem:[#allocation13 + $0xe4] sm:$0xf0]  ;;  %537 = vmatpush.bf16.msra.mxu3 %v1498_v38  ;;  %v1682_v32 = vor.u32 %v1966_v30, %v1681_v28  ;;  %v1657_v38 = vld [vmem:[#allocation13 + $0x158] sm:$0xf]  ;;  %v2513_v30 = vld [vmem:[#allocation14] sm:$0x7] }
  0xd4   :  { %951 = vmatpush.bf16.msra.mxu1 %v1762_v58  ;;  %748 = vmatpush.bf16.msrb.mxu2 %v1606_v39  ;;  %v1594_v45 = vor.u32 %v1943_v40, %v1591_v41  ;;  %v1729_v58 = vld [vmem:[#allocation11 + $0x68] sm:$0xf]  ;;  %v1670_v39 = vor.u32 %v1963_v37, %v1669_v36  ;;  %v1960_v40 = vld [vmem:[#allocation13 + $0x160] sm:$0xf0]  ;;  %v1840_v37 = vld [vmem:[#allocation11 + $0x140] sm:$0xf] }
  0xd5   :  { %942 = vmatpush.bf16.msra.mxu0 %v1710_v43  ;;  %v1730_v60 = vor.u32 %v1978_v59, %v1729_v58  ;;  %v1834_v36 = vld [vmem:[#allocation11 + $0x144] sm:$0xf0] }
  0xd7   :  { %538 = vmatpush.bf16.msra.mxu3 %v1486_v11  ;;  %v2009_v11 = vld [vmem:[#allocation11 + $0x16c] sm:$0xf] }
  0xd8   :  { %952 = vmatpush.bf16.msra.mxu1 %v1750_v6  ;;  %749 = vmatpush.bf16.msrb.mxu2 %v1594_v45  ;;  %v1972_v6 = vld [vmem:[#allocation11 + $0x40] sm:$0xf0]  ;;  %v1658_v45 = vor.u32 %v1960_v40, %v1657_v38  ;;  %v1861_v16 = vor.u32 %v2009_v11, %v1858_v13  ;;  %v2005_v38 = vld [vmem:[#allocation11 + $0x148] sm:$0xf0]  ;;  %v1796_v11 = vld [vmem:[#allocation11 + $0xf0] sm:$0xf] }
  0xd9   :  { %v1706_v8 = vor.u32 %v1972_v6, %v1705_v5  ;;  %943 = vmatpush.bf16.msra.mxu0 %v1698_v3  ;;  %v1597_v3 = vld [vmem:[#allocation13 + $0xe0] sm:$0xf]  ;;  %v1585_v6 = vld [vmem:[#allocation13 + $0xc8] sm:$0xf]  ;;  %v1994_v13 = vld [vmem:[#allocation11 + $0xf4] sm:$0xf] }
  0xda   :  { %539 = vmatmul.bf16.vlgmr.msra.gmra.mxu3 %v2489_v42  ;;  %v2502_v42 = vpop.f32.mrf.mxu2  ;;  %v1598_v5 = vor.u32 %v1945_v4, %v1597_v3  ;;  %v1810_v4 = vld [vmem:[#allocation11 + $0x114] sm:$0xf0] }
  0xdb   :  { %756 = vmatpush.bf16.msrb.mxu3 %v1670_v39  ;;  %v385_v39 = vperm.slane %v2513_v30, 1 }
  0xdc   :  { %953 = vmatpush.bf16.msra.mxu1 %v1738_v19  ;;  %750 = vmatpush.bf16.msrb.mxu2 %v1582_v50  ;;  %v1969_v19 = vld [vmem:[#allocation11 + $0x28] sm:$0xf0] }
  0xdd   :  { %v1694_v21 = vor.u32 %v1969_v19, %v1693_v18  ;;  %944 = vmatpush.bf16.msra.mxu0 %v1686_v15  ;;  %v2011_v15 = vld [vmem:[#allocation11 + $0x178] sm:$0xf0]  ;;  %v1844_v19 = vld [vmem:[#allocation11 + $0x150] sm:$0xf] }
  0xde   :  { %v1865_v18 = vor.u32 %v2011_v15, %v1864_v14  ;;  %v1798_v14 = vld [vmem:[#allocation11 + $0xfc] sm:$0xf0] }
  0xdf   :  { %751 = vmatmul.bf16.vlgmr.msrb.gmra.mxu2 %v2497_v27  ;;  %757 = vmatpush.bf16.msrb.mxu3 %v1658_v45 }
  0xe0   :  { %954 = vmatpush.bf16.msra.mxu1 %v1726_v33  ;;  %964 = vmatpush.bf16.msra.mxu2 %v1766_v51  ;;  %v2040_v33 = vld [vmem:[#allocation10] ss:$0 sm:$0xff] }
  0xe1   :  { %945 = vmatpush.bf16.msra.mxu0 %v1674_v25  ;;  %v2008_v25 = vld [vmem:[#allocation11 + $0x160] sm:$0xf0] }
  0xe2   :  { %v529_v50 = vpop.f32.mrf.mxu2  ;;  %v1853_v28 = vor.u32 %v2008_v25, %v1852_v24  ;;  %v1784_v24 = vld [vmem:[#allocation11 + $0xd8] sm:$0xf]  ;;  %v1992_v25 = vld [vmem:[#allocation11 + $0xe0] sm:$0xf0] }
  0xe3   :  { %738 = vmatmul.bf16.vlgmr.msrb.gmra.mxu1 %v2497_v27  ;;  %758 = vmatpush.bf16.msrb.mxu3 %v1646_v49  ;;  %v1822_v50 = vld [vmem:[#allocation11 + $0x12c] sm:$0xf0] }
  0xe4   :  { %955 = vmatpush.bf16.msra.mxu1 %v1714_v44  ;;  %965 = vmatpush.bf16.msra.mxu2 %v1754_v54 }
  0xe5   :  { %1209 = vmatpush.bf16.msrb.mxu0 %v1861_v16 }
  0xe7   :  { %v2504_v44 = vpop.f32.mrf.mxu0 }
  0xe8   :  { %966 = vmatpush.bf16.msra.mxu2 %v1742_v57  ;;  %956 = vmatpush.bf16.msra.mxu1 %v1702_v7  ;;  %v1954_v57 = vld [vmem:[#allocation13 + $0x130] sm:$0xf0] }
  0xe9   :  { %v1634_v59 = vor.u32 %v1954_v57, %v1633_v56  ;;  %v1942_v7 = vld [vmem:[#allocation13 + $0xd0] sm:$0xf0]  ;;  %v1825_v57 = vor.u32 %v2000_v48, %v1822_v50 }
  0xeb   :  { %759 = vmatpush.bf16.msrb.mxu3 %v1634_v59 }
  0xec   :  { %967 = vmatpush.bf16.msra.mxu2 %v1730_v60  ;;  %957 = vmatpush.bf16.msra.mxu1 %v1690_v20  ;;  %v1621_v60 = vld [vmem:[#allocation13 + $0x110] sm:$0xf]  ;;  %v2007_v20 = vld [vmem:[#allocation11 + $0x158] sm:$0xf0] }
  0xed   :  { %v1622_v62 = vor.u32 %v1951_v61, %v1621_v60  ;;  %v1845_v22 = vor.u32 %v2007_v20, %v1844_v19  ;;  %v1804_v19 = vld [vmem:[#allocation11 + $0xf8] sm:$0xf]  ;;  %v1996_v20 = vld [vmem:[#allocation11 + $0x100] sm:$0xf0] }
  0xef   :  { %v555_v52 = vpop.f32.mrf.mxu0  ;;  %760 = vmatpush.bf16.msrb.mxu3 %v1622_v62 }
  0xf0   :  { %968 = vmatpush.bf16.msra.mxu2 %v1718_v63  ;;  %958 = vmatpush.bf16.msra.mxu1 %v1678_v31  ;;  %v1609_v63 = vld [vmem:[#allocation13 + $0xf8] sm:$0xf]  ;;  %v2518_v31 = vld [vmem:[%s2567_s8] sm:$0x7] }
  0xf1   :  { %v1610_v2 = vor.u32 %v1948_v0, %v1609_v63  ;;  %v805_v45 = vperm.slane %v2518_v31, 1  ;;  %v1828_v52 = vld [vmem:[#allocation11 + $0x128] sm:$0xf] }
  0xf2   :  { %v1808_v0 = vld [vmem:[#allocation11 + $0x108] sm:$0xf] }
  0xf3   :  { %761 = vmatpush.bf16.msrb.mxu3 %v1610_v2  ;;  %v1997_v2 = vld [vmem:[#allocation11 + $0x10c] sm:$0xf] }
  0xf4   :  { %969 = vmatpush.bf16.msra.mxu2 %v1706_v8  ;;  %v1586_v8 = vor.u32 %v1942_v7, %v1585_v6  ;;  %1222 = vmatpush.bf16.msrb.mxu1 %v1865_v18  ;;  %v1999_v6 = vld [vmem:[#allocation11 + $0x118] sm:$0xf0]  ;;  %v1801_v18 = vor.u32 %v1994_v13, %v1798_v14 }
  0xf7   :  { %762 = vmatpush.bf16.msrb.mxu3 %v1598_v5  ;;  %v1816_v5 = vld [vmem:[#allocation11 + $0x110] sm:$0xf] }
  0xf8   :  { %970 = vmatpush.bf16.msra.mxu2 %v1694_v21  ;;  %v2006_v21 = vld [vmem:[#allocation11 + $0x154] sm:$0xf]  ;;  %1223 = vmatpush.bf16.msrb.mxu1 %v1853_v28  ;;  %v1785_v28 = vor.u32 %v1992_v25, %v1784_v24 }
  0xf9   :  { %v1849_v26 = vor.u32 %v2006_v21, %v1846_v23  ;;  %v1805_v23 = vor.u32 %v1996_v20, %v1804_v19  ;;  %v2018_v24 = vld [vmem:[#allocation16 + $0x30] sm:$0xff] }
  0xfb   :  { %763 = vmatpush.bf16.msrb.mxu3 %v1586_v8  ;;  %1210 = vmatpush.bf16.msrb.mxu0 %v1849_v26  ;;  %v1813_v8 = vor.u32 %v1997_v2, %v1810_v4  ;;  %v1991_v26 = vld [vmem:[#allocation11 + $0xdc] sm:$0xf]  ;;  %v806_v2 = vperm.slane %v2518_v31, 2 }
  0xfc   :  { %971 = vmatpush.bf16.msra.mxu2 %v1682_v32  ;;  %v1832_v32 = vld [vmem:[#allocation11 + $0x138] sm:$0xf] }
  0xfe   :  { %764 = vmatmul.bf16.vlgmr.msrb.gmra.mxu3 %v2497_v27  ;;  %v384_v27 = vperm.slane %v2513_v30, 0 }
  0xff   :  { %1196 = vmatpush.bf16.msra.mxu3 %v1857_v12  ;;  %v1995_v12 = vld [vmem:[#allocation11 + $0xf8] sm:$0xf0] }
 0x100   :  { %v1797_v16 = vor.u32 %v1995_v12, %v1796_v11 }
 0x103   :  { %1197 = vmatpush.bf16.msra.mxu3 %v1845_v22 }
 0x150   :  { %v343_v34 = vpop.f32.mrf.mxu1 }
 0x151   :  { %v344_v35 = vadd.f32 %v2040_v33, %v343_v34  ;;  %v2004_v33 = vld [vmem:[#allocation11 + $0x140] sm:$0xf0]  ;;  %v2003_v34 = vld [vmem:[#allocation11 + $0x13c] sm:$0xf] }
 0x152   :  { %v1837_v40 = vor.u32 %v2003_v34, %v1834_v36  ;;  %v1993_v34 = vld [vmem:[#allocation11 + $0xe8] sm:$0xf0] }
 0x153   :  { %2044 = vtanh.f32 %v344_v35  ;;  %v1833_v35 = vor.u32 %v2004_v33, %v1832_v32  ;;  %v1786_v32 = vld [vmem:[#allocation11 + $0xe4] sm:$0xf0]  ;;  %v1792_v33 = vld [vmem:[#allocation11 + $0xe0] sm:$0xf] }
 0x154   :  { %1211 = vmatpush.bf16.msrb.mxu0 %v1837_v40  ;;  %v1793_v36 = vor.u32 %v1993_v34, %v1792_v33 }
 0x155   :  { %1198 = vmatpush.bf16.msra.mxu3 %v1833_v35  ;;  %v1789_v35 = vor.u32 %v1991_v26, %v1786_v32 }
 0x158   :  { %v345_v41 = vpop.f32.mrf.mxu1  ;;  %1212 = vmatpush.bf16.msrb.mxu0 %v1825_v57 }
 0x159   :  { %v2045_v43 = vpop.eup %2044  ;;  %v1841_v41 = vor.u32 %v2005_v38, %v1840_v37  ;;  %v1772_v37 = vld [vmem:[#allocation11 + $0xc0] sm:$0xf]  ;;  %v1989_v38 = vld [vmem:[#allocation11 + $0xc8] sm:$0xf0] }
 0x15a   :  { %v769_v46 = vpack.c.bf16 %v2045_v43, %v2045_v43  ;;  %v804_v43 = vperm.slane %v2518_v31, 0  ;;  %v1773_v40 = vor.u32 %v1989_v38, %v1772_v37  ;;  %v2016_v38 = vld [vmem:[#allocation16 + $0x20] sm:$0xff] }
 0x15b   :  { %1224 = vmatpush.bf16.msrb.mxu1 %v1841_v41  ;;  %v1774_v41 = vld [vmem:[#allocation11 + $0xcc] sm:$0xf0] }
 0x15c   :  { %946 = vmatmul.bf16.vlgmr.msra.gmra.mxu0 %v769_v46  ;;  %959 = vmatmul.bf16.vlgmr.msra.gmra.mxu1 %v769_v46 }
 0x15d   :  { %972 = vmatmul.bf16.vlgmr.msra.gmra.mxu2 %v769_v46  ;;  %v2510_v58 = vpop.f32.mrf.mxu3  ;;  %v1820_v46 = vld [vmem:[#allocation11 + $0x120] sm:$0xf]  ;;  %1213 = vmatpush.bf16.msrb.mxu0 %v1813_v8 }
 0x15e   :  { %v1821_v49 = vor.u32 %v2001_v47, %v1820_v46  ;;  %v541_v56 = vadd.f32 %v2510_v58, %v385_v39  ;;  %v1817_v58 = vor.u32 %v1999_v6, %v1816_v5 }
 0x160   :  { %v2506_v51 = vpop.f32.mrf.mxu1  ;;  %1199 = vmatpush.bf16.msra.mxu3 %v1821_v49 }
 0x161   :  { %1214 = vmatpush.bf16.msrb.mxu0 %v1801_v18 }
 0x162   :  { %v2508_v54 = vpop.f32.mrf.mxu2 }
 0x165   :  { %v542_v1 = vpop.f32.mrf.mxu3  ;;  %1215 = vmatpush.bf16.msrb.mxu0 %v1789_v35 }
 0x166   :  { %v1998_v1 = vld [vmem:[#allocation11 + $0x110] sm:$0xf0] }
 0x167   :  { %v1809_v3 = vor.u32 %v1998_v1, %v1808_v0 }
 0x168   :  { %v741_v53 = vpop.f32.mrf.mxu1 }
 0x169   :  { %v2002_v53 = vld [vmem:[#allocation11 + $0x130] sm:$0xf0]  ;;  %1200 = vmatpush.bf16.msra.mxu3 %v1809_v3 }
 0x16a   :  { %v754_v55 = vpop.f32.mrf.mxu2  ;;  %v1829_v59 = vor.u32 %v2002_v53, %v1828_v52 }
 0x16b   :  { %v528_v55 = vadd.f32 %v2502_v42, %v384_v27  ;;  %v1988_v27 = vld [vmem:[#allocation11 + $0xc4] sm:$0xf] }
 0x16c   :  { %1225 = vmatpush.bf16.msrb.mxu1 %v1829_v59  ;;  %v1777_v48 = vor.u32 %v1988_v27, %v1774_v41 }
 0x16d   :  { %1201 = vmatpush.bf16.msra.mxu3 %v1797_v16 }
 0x16e   :  { %1216 = vmatpush.bf16.msrb.mxu0 %v1777_v48 }
 0x170   :  { %1226 = vmatpush.bf16.msrb.mxu1 %v1817_v58 }
 0x171   :  { %1202 = vmatpush.bf16.msra.mxu3 %v1785_v28  ;;  %v2017_v28 = vld [vmem:[#allocation16 + $0x28] sm:$0xff] }
 0x174   :  { %1227 = vmatpush.bf16.msrb.mxu1 %v1805_v23  ;;  %v594_v23 = vld [vmem:[#allocation14 + $0x3] sm:$0x7] }
 0x175   :  { %1203 = vmatpush.bf16.msra.mxu3 %v1773_v40  ;;  %v597_v25 = vperm.slane %v594_v23, 1  ;;  %v596_v35 = vperm.slane %v594_v23, 0  ;;  %v2015_v40 = vld [vmem:[#allocation16 + $0x18] sm:$0xff] }
 0x177   :  { %v753_v32 = vadd.f32 %v2508_v54, %v597_v25  ;;  %v740_v41 = vadd.f32 %v2506_v51, %v596_v35  ;;  %v2014_v54 = vld [vmem:[#allocation16 + $0x10] sm:$0xff] }
 0x178   :  { %1228 = vmatpush.bf16.msrb.mxu1 %v1793_v36 }
 0x1d9   :  { %v947_v60 = vpop.f32.mrf.mxu0  ;;  %v960_v61 = vpop.f32.mrf.mxu1 }
 0x1da   :  { %v948_v62 = vadd.f32 %v947_v60, %v804_v43  ;;  %v961_v63 = vadd.f32 %v960_v61, %v805_v45  ;;  %v1780_v43 = vld [vmem:[#allocation11 + $0xc8] sm:$0xf]  ;;  %v1990_v45 = vld [vmem:[#allocation11 + $0xd0] sm:$0xf0] }
 0x1db   :  { %v1781_v49 = vor.u32 %v1990_v45, %v1780_v43 }
 0x1dc   :  { %v977_v7 = vadd.f32 %v948_v62, %v528_v55  ;;  %v997_v42 = vadd.f32 %v961_v63, %v541_v56  ;;  %v386_v62 = vperm.slane %v2513_v30, 2 }
 0x1dd   :  { %1229 = vmatpush.bf16.msrb.mxu1 %v1781_v49 }
 0x1de   :  { %v1767_v9 = vmul.f32 -1.442695, %v977_v7  ;;  %v1768_v10 = vmul.f32 -1.442695, %v997_v42  ;;  %v554_v5 = vadd.f32 %v2504_v44, %v386_v62 }
 0x1e0   :  { %2046 = vpow2.f32 %v1767_v9  ;;  %v2526_v15 = vpop.f32.mrf.mxu2 }
 0x1e1   :  { %2048 = vpow2.f32 %v1768_v10  ;;  %v949_v21 = vpop.f32.mrf.mxu0  ;;  %v962_v22 = vpop.f32.mrf.mxu1  ;;  %v974_v30 = vadd.f32 %v2526_v15, %v806_v2 }
 0x1e2   :  { %v2533_v15 = vpop.f32.mrf.mxu3  ;;  %v2019_v21 = vld [vmem:[#allocation16 + $0x38] sm:$0xff]  ;;  %v2538_v22 = vld [vmem:[%s2567_s8 + $0x3] sm:$0x7] }
 0x1e3   :  { %1353 = vmatpush.bf16.msrb.mxu2 %v2019_v21  ;;  %v1062_v37 = vperm.slane %v2538_v22, 0 }
 0x1e6   :  { %v2047_v39 = vpop.eup %2046 }
 0x1e7   :  { %v2049_v46 = vpop.eup %2048  ;;  %v981_v47 = vadd.f32 1.0, %v2047_v39  ;;  %1354 = vmatpush.bf16.msrb.mxu2 %v2018_v24 }
 0x1e8   :  { %v1001_v50 = vadd.f32 1.0, %v2049_v46  ;;  %v975_v52 = vpop.f32.mrf.mxu2 }
 0x1e9   :  { %2050 = vrcp.f32 %v981_v47  ;;  %v993_v61 = vand.u32 2147483648, %v981_v47  ;;  %v991_v0 = vand.u32 2147483647, %v981_v47  ;;  %vm987_vm1 = vweird.f32 %v981_v47 }
 0x1ea   :  { %2052 = vrcp.f32 %v1001_v50  ;;  %v1013_v8 = vand.u32 2147483648, %v1001_v50  ;;  %vm1007_vm5 = vweird.f32 %v1001_v50  ;;  %v1011_v9 = vand.u32 2147483647, %v1001_v50  ;;  %v767_v20 = vpop.f32.mrf.mxu3 }
 0x1eb   :  { %v994_v4 = vor.u32 1.1754944e-38, %v993_v61  ;;  %vm992_vm3 = vcmp.eq.f32.partialorder %v991_v0, 8.507059e+37  ;;  %1355 = vmatpush.bf16.msrb.mxu2 %v2017_v28 }
 0x1ec   :  { %v1014_v11 = vor.u32 1.1754944e-38, %v1013_v8  ;;  %vm1012_vm7 = vcmp.eq.f32.partialorder %v1011_v9, 8.507059e+37 }
 0x1ef   :  { %v2051_v53 = vpop.eup %2050  ;;  %1356 = vmatpush.bf16.msrb.mxu2 %v2016_v38 }
 0x1f0   :  { %v2053_v55 = vpop.eup %2052  ;;  %v983_v56 = vmul.f32 %v2051_v53, %v981_v47  ;;  %vm988_vm0 = vweird.f32 %v2051_v53 }
 0x1f1   :  { %v1003_v57 = vmul.f32 %v2053_v55, %v1001_v50  ;;  %vm989_vm2 = vmor %vm987_vm1, %vm988_vm0  ;;  %vm1008_vm4 = vweird.f32 %v2053_v55 }
 0x1f2   :  { %v984_v59 = vsub.f32 1.0, %v983_v56  ;;  %vm1009_vm6 = vmor %vm1007_vm5, %vm1008_vm4 }
 0x1f3   :  { %v1004_v60 = vsub.f32 1.0, %v1003_v57  ;;  %1357 = vmatpush.bf16.msrb.mxu2 %v2015_v40 }
 0x1f4   :  { %v985_v63 = vmul.f32 %v2051_v53, %v984_v59 }
 0x1f5   :  { %v1005_v1 = vmul.f32 %v2053_v55, %v1004_v60 }
 0x1f6   :  { %v986_v3 = vadd.f32 %v2051_v53, %v985_v63 }
 0x1f7   :  { %v1006_v42 = vadd.f32 %v2053_v55, %v1005_v1  ;;  %1358 = vmatpush.bf16.msrb.mxu2 %v2014_v54  ;;  %v598_v1 = vperm.slane %v594_v23, 2 }
 0x1f8   :  { %v990_v6 = vsel %vm989_vm2, %v2051_v53, %v986_v3  ;;  %v2013_v53 = vld [vmem:[#allocation16 + $0x8] sm:$0xff] }
 0x1f9   :  { %v995_v7 = vsel %vm992_vm3, %v994_v4, %v990_v6  ;;  %v1010_v31 = vsel %vm1009_vm6, %v2053_v55, %v1006_v42  ;;  %v2012_v55 = vld [vmem:[#allocation16] sm:$0xff]  ;;  %v766_v42 = vadd.f32 %v2533_v15, %v598_v1 }
 0x1fa   :  { %v1017_v58 = vmul.f32 %v995_v7, %v554_v5  ;;  %v1015_v12 = vsel %vm1012_vm7, %v1014_v11, %v1010_v31  ;;  %v1064_v5 = vperm.slane %v2538_v22, 2 }
 0x1fb   :  { %v1020_v13 = vsub.f32 1.0, %v1015_v12  ;;  %v1022_v16 = vmul.f32 %v1015_v12, %v2485_v29  ;;  %v1063_v29 = vperm.slane %v2538_v22, 1  ;;  %1359 = vmatpush.bf16.msrb.mxu2 %v2013_v53  ;;  %v2041_v22 = vld [vmem:[%s2570_s11] ss:$0 sm:$0xff]  ;;  %s2574_s11 = smov 128  }
 0x1fc   :  { %v1018_v10 = vadd.f32 %v1017_v58, %v974_v30 }
 0x1fe   :  { %2054 = vtanh.f32 %v1018_v10 }
 0x1ff   :  { %1360 = vmatpush.bf16.msrb.mxu2 %v2012_v55 }
 0x204   :  { %v2055_v44 = vpop.eup %2054 }
 0x205   :  { %v1021_v14 = vmul.f32 %v2055_v44, %v1020_v13 }
 0x207   :  { %v1023_v18 = vadd.f32 %v1022_v16, %v1021_v14 }
 0x209   :  { %v1025_v19 = vpack.c.bf16 %v1023_v18, %v1023_v18  ;;  %1024 = vst [vmem:[#allocation18] sm:$0xff] %v1023_v18 }
 0x20b   :  { %1204 = vmatmul.bf16.vlgmr.msra.gmra.mxu3 %v1025_v19  ;;  %1217 = vmatmul.bf16.vlgmr.msrb.gmra.mxu0 %v1025_v19 }
 0x20c   :  { %1230 = vmatmul.bf16.vlgmr.msrb.gmra.mxu1 %v1025_v19 }
 0x288   :  { %v1218_v26 = vpop.f32.mrf.mxu0 }
 0x289   :  { %v1219_v33 = vadd.f32 %v1218_v26, %v1063_v29  ;;  %v1231_v34 = vpop.f32.mrf.mxu1 }
 0x28a   :  { %v1232_v9 = vadd.f32 %v1231_v34, %v1064_v5 }
 0x28b   :  { %v1255_v36 = vadd.f32 %v1219_v33, %v753_v32 }
 0x28d   :  { %v1867_v27 = vmul.f32 -1.442695, %v1255_v36 }
 0x28e   :  { %v1205_v39 = vpop.f32.mrf.mxu3 }
 0x28f   :  { %2056 = vpow2.f32 %v1867_v27  ;;  %v1206_v43 = vadd.f32 %v1205_v39, %v1062_v37 }
 0x290   :  { %v1220_v45 = vpop.f32.mrf.mxu0 }
 0x291   :  { %v1235_v46 = vadd.f32 %v1206_v43, %v740_v41  ;;  %v1233_v47 = vpop.f32.mrf.mxu1 }
 0x293   :  { %v1866_v48 = vmul.f32 -1.442695, %v1235_v46 }
 0x295   :  { %v2057_v49 = vpop.eup %2056  ;;  %2058 = vpow2.f32 %v1866_v48 }
 0x296   :  { %v1259_v50 = vadd.f32 1.0, %v2057_v49  ;;  %v1207_v52 = vpop.f32.mrf.mxu3 }
 0x298   :  { %2060 = vrcp.f32 %v1259_v50  ;;  %v1271_v10 = vand.u32 2147483648, %v1259_v50  ;;  %vm1265_vm13 = vweird.f32 %v1259_v50  ;;  %v1269_v11 = vand.u32 2147483647, %v1259_v50 }
 0x29a   :  { %v1272_v44 = vor.u32 1.1754944e-38, %v1271_v10  ;;  %vm1270_vm15 = vcmp.eq.f32.partialorder %v1269_v11, 8.507059e+37 }
 0x29b   :  { %v2059_v56 = vpop.eup %2058 }
 0x29c   :  { %v1239_v57 = vadd.f32 1.0, %v2059_v56 }
 0x29e   :  { %2062 = vrcp.f32 %v1239_v57  ;;  %v2061_v51 = vpop.eup %2060  ;;  %v1251_v0 = vand.u32 2147483648, %v1239_v57  ;;  %v1249_v3 = vand.u32 2147483647, %v1239_v57  ;;  %vm1245_vm9 = vweird.f32 %v1239_v57 }
 0x29f   :  { %v1261_v59 = vmul.f32 %v2061_v51, %v1259_v50  ;;  %vm1266_vm12 = vweird.f32 %v2061_v51 }
 0x2a0   :  { %v1252_v7 = vor.u32 1.1754944e-38, %v1251_v0  ;;  %vm1250_vm11 = vcmp.eq.f32.partialorder %v1249_v3, 8.507059e+37  ;;  %vm1267_vm14 = vmor %vm1265_vm13, %vm1266_vm12 }
 0x2a1   :  { %v1262_v62 = vsub.f32 1.0, %v1261_v59 }
 0x2a3   :  { %v1263_v4 = vmul.f32 %v2061_v51, %v1262_v62 }
 0x2a4   :  { %v2063_v60 = vpop.eup %2062 }
 0x2a5   :  { %v1241_v61 = vmul.f32 %v2063_v60, %v1239_v57  ;;  %vm1246_vm8 = vweird.f32 %v2063_v60  ;;  %v1264_v58 = vadd.f32 %v2061_v51, %v1263_v4 }
 0x2a6   :  { %vm1247_vm10 = vmor %vm1245_vm9, %vm1246_vm8 }
 0x2a7   :  { %v1242_v63 = vsub.f32 1.0, %v1241_v61  ;;  %v1268_v13 = vsel %vm1267_vm14, %v2061_v51, %v1264_v58 }
 0x2a8   :  { %v1273_v14 = vsel %vm1270_vm15, %v1272_v44, %v1268_v13 }
 0x2a9   :  { %v1243_v2 = vmul.f32 %v2063_v60, %v1242_v63  ;;  %v1278_v16 = vsub.f32 1.0, %v1273_v14  ;;  %v1280_v15 = vmul.f32 %v1273_v14, %v2493_v17 }
 0x2ab   :  { %v1244_v6 = vadd.f32 %v2063_v60, %v1243_v2 }
 0x2ad   :  { %v1248_v8 = vsel %vm1247_vm10, %v2063_v60, %v1244_v6 }
 0x2ae   :  { %v1253_v30 = vsel %vm1250_vm11, %v1252_v7, %v1248_v8 }
 0x2af   :  { %v1275_v31 = vmul.f32 %v1253_v30, %v766_v42 }
 0x2b1   :  { %v1276_v12 = vadd.f32 %v1275_v31, %v1232_v9 }
 0x2b3   :  { %2064 = vtanh.f32 %v1276_v12 }
 0x2b9   :  { %v2065_v18 = vpop.eup %2064 }
 0x2ba   :  { %v1279_v19 = vmul.f32 %v2065_v18, %v1278_v16 }
 0x2bc   :  { %v1281_v20 = vadd.f32 %v1280_v15, %v1279_v19 }
 0x2be   :  { %v1284_v21 = vpack.c.bf16 %v1281_v20, %v1281_v20  ;;  %1283 = vst [vmem:[#allocation18 + $0x8] sm:$0xff] %v1281_v20 }
 0x2bf   :  { %1399 = dma.vmem_to_hbm [thread:$0]  %s1392_s26, 256, %s1394_s25, [#allocation19], %s2574_s11, %s2574_s11, %s2350_s14  }
 0x2c0   :  { %1361 = vmatmul.bf16.vlgmr.msrb.gmra.mxu2 %v1284_v21 }
 0x343   :  { %v1362_v23 = vpop.f32.mrf.mxu2 }
 0x344   :  { %v1363_v24 = vadd.f32 %v2041_v22, %v1362_v23 }
 0x346   :  { %1366 = vmax.xlane.f32.xlu0 %v1363_v24 }
 0x34b   :  { %v1364_v25 = vpop.f32.mrf.mxu2 }
 0x3b9   :  { %v1367_v29 = vpop.xlane.xlu0 %1366 }
 0x3ba   :  { %v1368_v26 = vsub.f32 %v1363_v24, %v1367_v29 }
 0x3bc   :  { %v1369_v28 = vmul.f32 1.442695, %v1368_v26 }
 0x3be   :  { %2066 = vpow2.f32 %v1369_v28 }
 0x3c4   :  { %v2067_v32 = vpop.eup %2066 }
 0x3c5   :  { %1371 = vadd.xlane.f32.xlu0 %v2067_v32 }
 0x438   :  { %v1372_v17 = vpop.xlane.xlu0 %1371 }
 0x439   :  { %2068 = vrcp.f32 %v1372_v17 }
 0x43f   :  { %v2069_v33 = vpop.eup %2068 }
 0x440   :  { %v1374_v34 = vmul.f32 %v2069_v33, %v2067_v32 }
 0x442   :  { %1375 = vst [vmem:[#allocation17] sm:$0xff] %v1374_v34 }
 0x443   :  { %1386 = dma.vmem_to_hbm [thread:$0]  %s1382_s27, 128, %s1384_s16, [#allocation4]  }
 0x444   :  { %2344 = dma.done.wait [#allocation4], 128  }
 0x445   :  { %2345 = vsyncadd [#allocation4], 4294967168 }
 0x446   :  { %2346 = dma.done.wait [#allocation19], 256  }
 0x447   :  { %2347 = vsyncadd [#allocation19], 4294967040 }
 0x448   :  { %1408 = vsyncpa [#allocation3], 1 }
 0x449   :  { %1409 = vsyncpa [#allocation6], 1 }
 0x44a   :  { %1410 = vsyncpa [#allocation9], 1 }
 0x44b   :  { %1411 = vsyncpa [#allocation12], 1 }
 0x44c   :  { %1412 = vsyncpa [#allocation15], 1 }
 0x44d   :  { %1413 = vsyncpa [#allocation4], 1 }
 0x44e   :  { %1414 = vsyncpa [#allocation19], 1 }

</bundles_post_ra>
